<compile_context>
chip_gen: v5e
topology: v5e:2x2
jax: 0.10.0
libtpu: 0.0.40
codegen_flags: <defaults>
</compile_context>

<pallas_src>
import functools
import math

import jax
import jax.numpy as jnp
import numpy as np
from jax.experimental import pallas as pl
from jax.experimental.pallas import tpu as pltpu

LANE = 128   # feature / lane tile
SUB = 8      # sublane tile


def _round_up(x, m):
    return ((x + m - 1) // m) * m


# ----------------------------- Pallas kernels --------------------------------

def feature_transform_kernel(x_ref, w_ref, o_ref):
    """Prologue: XW1[i] = X[i] @ W1 (hoisted out of the Â reduction loop)."""
    o_ref[...] = jnp.dot(x_ref[...], w_ref[...],
                         preferred_element_type=jnp.float32).astype(o_ref.dtype)


def gcn_layer1_kernel(rows_ref, cols_ref, firsts_ref, lasts_ref,
                      a_ref, xw_ref, w2_ref, b1_ref, out_ref, acc_ref):
    """Flattened-schedule GCN layer 1 with W2' folded into the finalize.

    Grid step s processes the nonzero Â block (rows[s], cols[s]):
        acc += Â[rows[s], cols[s]] @ XW1[cols[s]]
    and on the last block of a row tile writes
        out[rows[s]] = relu(acc + b1) @ W2'
    so layer 2's inner body is again a single Â @ (.) matmul.
    """
    s = pl.program_id(0)

    @pl.when(firsts_ref[s] == 1)
    def _init():
        acc_ref[...] = jnp.zeros_like(acc_ref)

    acc_ref[...] += jnp.dot(a_ref[...], xw_ref[...],
                            preferred_element_type=jnp.float32)

    @pl.when(lasts_ref[s] == 1)
    def _finalize():
        h = jnp.maximum(acc_ref[...] + b1_ref[...][0:1, :], 0.0)
        out_ref[...] = jnp.dot(h.astype(w2_ref.dtype), w2_ref[...],
                               preferred_element_type=jnp.float32
                               ).astype(out_ref.dtype)


def gcn_layer2_pool_kernel(rows_ref, cols_ref, firsts_ref, lasts_ref,
                           a_ref, hw_ref, p_ref, b2_ref, bo_ref,
                           out_ref, acc_ref):
    """Flattened-schedule GCN layer 2 with mean pooling fused into finalize.

        acc += Â[rows[s], cols[s]] @ H1W2[cols[s]]
        (last block of row tile)  logits += P[:, rows[s]] @ (acc + b2')
        (last grid step)          logits += bout
    """
    s = pl.program_id(0)

    @pl.when(s == 0)
    def _init_logits():
        out_ref[...] = jnp.zeros_like(out_ref)

    @pl.when(firsts_ref[s] == 1)
    def _init_acc():
        acc_ref[...] = jnp.zeros_like(acc_ref)

    acc_ref[...] += jnp.dot(a_ref[...], hw_ref[...],
                            preferred_element_type=jnp.float32)

    @pl.when(lasts_ref[s] == 1)
    def _pool_row_tile():
        h = acc_ref[...] + b2_ref[...][0:1, :]
        out_ref[...] += jnp.dot(p_ref[...], h.astype(p_ref.dtype),
                                preferred_element_type=jnp.float32)

    @pl.when(s == pl.num_programs(0) - 1)
    def _add_output_bias():
        out_ref[...] += bo_ref[...][0:1, :]


# ------------------------------ host-side helpers ------------------------------

def _pad2d(x, rows, cols, dtype):
    x = jnp.asarray(x, dtype)
    return jnp.pad(x, ((0, rows - x.shape[0]), (0, cols - x.shape[1])))


def build_gcn_norm_adj(edge_index, num_nodes):
    """Dense Â per PyG gcn_norm(add_self_loops=False): both normalization
    factors use the in-degree vector (degree over edge targets)."""
    src = edge_index[0]
    dst = edge_index[1]
    a = jnp.zeros((num_nodes, num_nodes), jnp.float32).at[dst, src].add(1.0)
    deg = jnp.zeros((num_nodes,), jnp.float32).at[dst].add(1.0)
    dis = jnp.where(deg > 0, 1.0 / jnp.sqrt(jnp.maximum(deg, 1.0)), 0.0)
    return dis[:, None] * a * dis[None, :]


def build_mean_pool(batch, num_graphs, num_nodes):
    onehot = (batch[None, :] == jnp.arange(num_graphs)[:, None]).astype(jnp.float32)
    counts = jnp.maximum(onehot.sum(axis=1, keepdims=True), 1.0)
    return onehot / counts


def _pick_tile(graph_sizes, num_nodes):
    """Tile ≈ typical graph size rounded to 128, capped at 512."""
    if graph_sizes:
        typical = int(np.median(np.asarray(graph_sizes, dtype=np.int64)))
    else:
        typical = int(num_nodes)
    return int(min(512, max(LANE, _round_up(max(typical, 1), LANE))))


def build_block_schedule(graph_sizes, num_nodes, tile):
    """Host-only: nonzero (row-tile, col-tile) blocks of the block-diagonal Â,
    derived from graph sizes (PyG batching: each graph's nodes contiguous).
    Returns rows, cols, first-of-row, last-of-row int32 arrays (row-sorted)."""
    n_tiles = _round_up(max(num_nodes, 1), tile) // tile
    if graph_sizes is None:
        blocks = {(i, k) for i in range(n_tiles) for k in range(n_tiles)}
    else:
        blocks = set()
        off = 0
        for size in graph_sizes:
            size = int(size)
            if size <= 0:
                continue
            t0, t1 = off // tile, (off + size - 1) // tile
            for i in range(t0, t1 + 1):
                for k in range(t0, t1 + 1):
                    blocks.add((i, k))
            off += size
    blocks = sorted(blocks)
    rows = np.array([b[0] for b in blocks], dtype=np.int32)
    cols = np.array([b[1] for b in blocks], dtype=np.int32)
    firsts = np.ones_like(rows)
    lasts = np.ones_like(rows)
    for j in range(1, rows.size):
        if rows[j] == rows[j - 1]:
            firsts[j] = 0
            lasts[j - 1] = 0
    return rows, cols, firsts, lasts


def _vmem_limit(buffer_bytes):
    """Hardware-derived VMEM budget: footprint-scaled, <=75% of physical VMEM."""
    try:
        cap = int(pltpu.get_tpu_info().vmem_capacity_bytes)
    except Exception:
        cap = 64 << 20   # conservative (v7x physical VMEM)
    return int(min(cap * 3 // 4, max(4 * buffer_bytes, 8 << 20)))


# ------------------------------ pallas_call wrappers ---------------------------

def _feature_transform(x_p, w_p, *, tile):
    Np, Fp = x_p.shape
    bpe = x_p.dtype.itemsize
    buf = 4 * tile * Fp * bpe + Fp * Fp * bpe
    return pl.pallas_call(
        feature_transform_kernel,
        out_shape=jax.ShapeDtypeStruct((Np, Fp), x_p.dtype),
        grid_spec=pltpu.PrefetchScalarGridSpec(
            num_scalar_prefetch=0,
            grid=(Np // tile,),
            in_specs=[pl.BlockSpec((tile, Fp), lambda i: (i, 0)),
                      pl.BlockSpec((Fp, Fp), lambda i: (0, 0))],
            out_specs=pl.BlockSpec((tile, Fp), lambda i: (i, 0)),
        ),
        compiler_params=pltpu.CompilerParams(
            dimension_semantics=("parallel",),
            vmem_limit_bytes=_vmem_limit(buf)),
        cost_estimate=pl.CostEstimate(
            flops=int(2 * Np * Fp * Fp), transcendentals=0,
            bytes_accessed=int(2 * Np * Fp * bpe + Fp * Fp * bpe)),
    )(x_p, w_p)


def _gcn_layer1(a_p, xw_p, w2_p, b1_p, rows, cols, firsts, lasts, *,
                tile, out_dtype):
    Np = a_p.shape[0]
    Fp = xw_p.shape[1]
    visited = int(rows.shape[0])
    bpe = a_p.dtype.itemsize
    out_bpe = jnp.dtype(out_dtype).itemsize
    buf = (2 * tile * tile * bpe + 2 * tile * Fp * bpe + Fp * Fp * bpe
           + SUB * Fp * 4 + 2 * tile * Fp * out_bpe + tile * Fp * 4)
    flops = 2 * visited * tile * tile * Fp + 2 * (Np // tile) * tile * Fp * Fp
    bytes_accessed = (visited * tile * tile * bpe + visited * tile * Fp * bpe
                      + Fp * Fp * bpe + SUB * Fp * 4 + Np * Fp * out_bpe)
    return pl.pallas_call(
        gcn_layer1_kernel,
        out_shape=jax.ShapeDtypeStruct((Np, Fp), out_dtype),
        grid_spec=pltpu.PrefetchScalarGridSpec(
            num_scalar_prefetch=4,
            grid=(visited,),
            in_specs=[
                pl.BlockSpec((tile, tile),
                             lambda s, r, c, f, l: (r[s], c[s])),
                pl.BlockSpec((tile, Fp),
                             lambda s, r, c, f, l: (c[s], 0)),
                pl.BlockSpec((Fp, Fp),
                             lambda s, r, c, f, l: (0, 0)),
                pl.BlockSpec((SUB, Fp),
                             lambda s, r, c, f, l: (0, 0)),
            ],
            out_specs=pl.BlockSpec((tile, Fp),
                                   lambda s, r, c, f, l: (r[s], 0)),
            scratch_shapes=[pltpu.VMEM((tile, Fp), jnp.float32)],
        ),
        compiler_params=pltpu.CompilerParams(
            dimension_semantics=("arbitrary",),
            vmem_limit_bytes=_vmem_limit(buf)),
        cost_estimate=pl.CostEstimate(flops=int(flops), transcendentals=0,
                                      bytes_accessed=int(bytes_accessed)),
    )(rows, cols, firsts, lasts, a_p, xw_p, w2_p, b1_p)


def _gcn_layer2_pool(a_p, hw_p, p_p, b2_p, bo_p, rows, cols, firsts, lasts, *,
                     tile):
    Np = a_p.shape[0]
    Fp = hw_p.shape[1]
    Gp = p_p.shape[0]
    visited = int(rows.shape[0])
    bpe = a_p.dtype.itemsize
    buf = (2 * tile * tile * bpe + 2 * tile * Fp * bpe
           + 2 * Gp * tile * p_p.dtype.itemsize
           + 2 * SUB * Fp * 4 + Gp * Fp * 4 + tile * Fp * 4)
    n_i = Np // tile
    flops = 2 * visited * tile * tile * Fp + 2 * n_i * Gp * tile * Fp
    bytes_accessed = (visited * tile * tile * bpe + visited * tile * Fp * bpe
                      + Gp * Np * p_p.dtype.itemsize
                      + 2 * SUB * Fp * 4 + Gp * Fp * 4)
    return pl.pallas_call(
        gcn_layer2_pool_kernel,
        out_shape=jax.ShapeDtypeStruct((Gp, Fp), jnp.float32),
        grid_spec=pltpu.PrefetchScalarGridSpec(
            num_scalar_prefetch=4,
            grid=(visited,),
            in_specs=[
                pl.BlockSpec((tile, tile),
                             lambda s, r, c, f, l: (r[s], c[s])),
                pl.BlockSpec((tile, Fp),
                             lambda s, r, c, f, l: (c[s], 0)),
                pl.BlockSpec((Gp, tile),
                             lambda s, r, c, f, l: (0, r[s])),
                pl.BlockSpec((SUB, Fp),
                             lambda s, r, c, f, l: (0, 0)),
                pl.BlockSpec((SUB, Fp),
                             lambda s, r, c, f, l: (0, 0)),
            ],
            out_specs=pl.BlockSpec((Gp, Fp),
                                   lambda s, r, c, f, l: (0, 0)),
            scratch_shapes=[pltpu.VMEM((tile, Fp), jnp.float32)],
        ),
        compiler_params=pltpu.CompilerParams(
            dimension_semantics=("arbitrary",),
            vmem_limit_bytes=_vmem_limit(buf)),
        cost_estimate=pl.CostEstimate(flops=int(flops), transcendentals=0,
                                      bytes_accessed=int(bytes_accessed)),
    )(rows, cols, firsts, lasts, a_p, hw_p, p_p, b2_p, bo_p)


# ---------------------------------- forward ------------------------------------

def gnn_forward(x, edge_index, batch, params, num_graphs, graph_sizes=None, *,
                compute_dtype=jnp.bfloat16):
    """Forward pass of the default-config GNNModel.

    graph_sizes: host-side Python ints (graphs contiguous, PyG batching) used
    to build the static nonzero-block schedule. None -> dense schedule.
    """
    N, Din = x.shape
    W1, b1, W2, b2, Wout, bout = params
    Dout = Wout.shape[0]
    assert max(Din, W1.shape[1], W2.shape[1], Dout) <= LANE

    tile = _pick_tile(graph_sizes, N)
    Np = _round_up(max(N, 1), tile)
    Fp = LANE
    Gp = _round_up(max(num_graphs, 1), SUB)

    rows_np, cols_np, firsts_np, lasts_np = build_block_schedule(
        graph_sizes, N, tile)
    assert rows_np.size >= 1

    def _impl(x, edge_index, batch, W1, b1, W2, b2, Wout, bout):
        # Fold the frozen output Linear weight into the last conv. Exact: the
        # last conv has no ReLU and mean pooling is linear (identity Wout here).
        W2f = W2 @ Wout.T
        b2f = b2 @ Wout.T

        a_hat = build_gcn_norm_adj(edge_index, N)
        pool = build_mean_pool(batch, num_graphs, N)

        a_p = _pad2d(a_hat, Np, Np, compute_dtype)
        x_p = _pad2d(x, Np, Fp, compute_dtype)
        w1_p = _pad2d(W1, Fp, Fp, compute_dtype)
        w2_p = _pad2d(W2f, Fp, Fp, compute_dtype)
        b1_p = _pad2d(b1[None, :], SUB, Fp, jnp.float32)
        b2_p = _pad2d(b2f[None, :], SUB, Fp, jnp.float32)
        p_p = _pad2d(pool, Gp, Np, compute_dtype)
        bo_p = _pad2d(bout[None, :], SUB, Fp, jnp.float32)

        rows = jnp.asarray(rows_np)
        cols = jnp.asarray(cols_np)
        firsts = jnp.asarray(firsts_np)
        lasts = jnp.asarray(lasts_np)

        # Prologue: XW1 once (hoisted out of the reduction loop).
        xw1 = _feature_transform(x_p, w1_p, tile=tile)
        # Layer 1 (+ folded W2'), flattened nonzero-block grid.
        h1w2 = _gcn_layer1(a_p, xw1, w2_p, b1_p, rows, cols, firsts, lasts,
                           tile=tile, out_dtype=compute_dtype)
        # Layer 2 with mean pooling + output bias fused into the finalize.
        logits_p = _gcn_layer2_pool(a_p, h1w2, p_p, b2_p, bo_p,
                                    rows, cols, firsts, lasts, tile=tile)
        return logits_p[:num_graphs, :Dout]

    return jax.jit(_impl)(x, edge_index, batch, W1, b1, W2, b2, Wout, bout)


# ------------------------- deterministic parameters ---------------------------

def init_params(key, in_dim=3, hidden_dims=(3, 3), out_dim=3):
    k1, k2, k3, k4, k5 = jax.random.split(key, 5)
    dims = [in_dim] + list(hidden_dims)
    W1 = jax.random.normal(k1, (dims[0], dims[1]), jnp.float32) * (1.0 / math.sqrt(dims[0]))
    b1 = jax.random.normal(k2, (dims[1],), jnp.float32) * 0.1
    W2 = jax.random.normal(k3, (dims[1], dims[2]), jnp.float32) * (1.0 / math.sqrt(dims[1]))
    b2 = jax.random.normal(k4, (dims[2],), jnp.float32) * 0.1
    # lin_out weight: equiangular frame for (out_dim=3, hidden=3) -> identity (frozen)
    Wout = jnp.eye(out_dim, hidden_dims[-1], dtype=jnp.float32)
    bout = jax.random.normal(k5, (out_dim,), jnp.float32) * 0.1
    return (W1, b1, W2, b2, Wout, bout)


# ------------------------------ pure-JAX reference ----------------------------

def gnn_reference(x, edge_index, batch, params, num_graphs):
    W1, b1, W2, b2, Wout, bout = params
    a_hat = build_gcn_norm_adj(edge_index, x.shape[0])
    pool = build_mean_pool(batch, num_graphs, x.shape[0])
    h = jnp.maximum(a_hat @ (x @ W1) + b1, 0.0)
    h = a_hat @ (h @ W2) + b2
    r = pool @ h
    return r @ Wout.T + bout


# ----------------------------------- main --------------------------------------

if __name__ == "__main__":
    key = jax.random.PRNGKey(0)
    kx, kp = jax.random.split(key)

    # 3 disjoint bidirectional ring graphs of unequal size -> block-diagonal Â
    # whose zero tiles exercise the flattened nonzero-block schedule.
    graph_sizes = [128, 100, 60]
    num_graphs = len(graph_sizes)
    N = sum(graph_sizes)
    in_dim = 3

    src_list, dst_list, batch_list = [], [], []
    off = 0
    for g, n in enumerate(graph_sizes):
        for i in range(n):
            a, b = off + i, off + (i + 1) % n
            src_list += [a, b]
            dst_list += [b, a]
        batch_list += [g] * n
        off += n
    edge_index = jnp.array([src_list, dst_list], dtype=jnp.int32)
    batch = jnp.array(batch_list, dtype=jnp.int32)

    x = jax.random.normal(kx, (N, in_dim), jnp.float32)
    params = init_params(kp, in_dim=3, hidden_dims=(3, 3), out_dim=3)

    logits = gnn_forward(x, edge_index, batch, params, num_graphs,
                         graph_sizes=graph_sizes)
    logits = jax.block_until_ready(logits)

    ref = gnn_reference(x, edge_index, batch, params, num_graphs)
    assert logits.shape == (num_graphs, 3)
    # bf16 matmul operands with f32 accumulation (plus one bf16 re-quantization
    # of the layer-1 activations) -> compare loosely against the f32 reference.
    assert jnp.allclose(logits, ref, atol=5e-2, rtol=5e-2), (logits, ref)

    print("KERNEL_OK")
</pallas_src>

<mosaic_0001>
module attributes {stable_mosaic.version = 11 : i64} {
  func.func @feature_transform_kernel(%arg0: i32, %arg1: memref<128x128xbf16, #tpu.memory_space<vmem>>, %arg2: memref<128x128xbf16, #tpu.memory_space<vmem>>, %arg3: memref<128x128xbf16, #tpu.memory_space<vmem>>) attributes {dimension_semantics = [#tpu.dimension_semantics<parallel>], iteration_bounds = array<i64: 3>, scalar_prefetch = 0 : i64, scratch_operands = 0 : i64, tpu.core_type = #tpu.core_type<tc>, window_params = [{transform_indices = @transform_0, window_bounds = array<i64: 128, 128>}, {pipeline_mode = #tpu.pipeline_mode<synchronous>, transform_indices = @transform_1, window_bounds = array<i64: 128, 128>}, {transform_indices = @transform_2, window_bounds = array<i64: 128, 128>}]} {
    %c0 = arith.constant 0 : index
    %c0_0 = arith.constant 0 : index
    %0 = vector.load %arg1[%c0, %c0_0] : memref<128x128xbf16, #tpu.memory_space<vmem>>, vector<128x128xbf16>
    %c0_1 = arith.constant 0 : index
    %c0_2 = arith.constant 0 : index
    %1 = vector.load %arg2[%c0_1, %c0_2] : memref<128x128xbf16, #tpu.memory_space<vmem>>, vector<128x128xbf16>
    %cst = arith.constant dense<0.000000e+00> : vector<128x128xf32>
    %2 = tpu.matmul %0, %1, %cst {dimension_numbers = #tpu.dot_dimension_numbers<[1], [0], [0], [1], [0, 0, 1, 1], [], []>} : vector<128x128xbf16>, vector<128x128xbf16>, vector<128x128xf32> -> vector<128x128xf32>
    %3 = arith.truncf %2 : vector<128x128xf32> to vector<128x128xbf16>
    %c0_3 = arith.constant 0 : index
    %c0_4 = arith.constant 0 : index
    %4 = vector.load %arg3[%c0_3, %c0_4] : memref<128x128xbf16, #tpu.memory_space<vmem>>, vector<128x128xbf16>
    tpu.vector_store %arg3[%c0_3, %c0_4], %3 {strides = array<i32>} : memref<128x128xbf16, #tpu.memory_space<vmem>>, vector<128x128xbf16>,
    return
  }
  func.func @transform_0(%arg0: i32) -> (i32, i32) {
    %c0_i32 = arith.constant 0 : i32
    %c0_i32_0 = arith.constant 0 : i32
    return %arg0, %c0_i32 : i32, i32
  }
  func.func @transform_1(%arg0: i32) -> (i32, i32) {
    %c0_i32 = arith.constant 0 : i32
    %c0_i32_0 = arith.constant 0 : i32
    %c0_i32_1 = arith.constant 0 : i32
    return %c0_i32, %c0_i32_0 : i32, i32
  }
  func.func @transform_2(%arg0: i32) -> (i32, i32) {
    %c0_i32 = arith.constant 0 : i32
    %c0_i32_0 = arith.constant 0 : i32
    return %arg0, %c0_i32 : i32, i32
  }
}

module attributes {stable_mosaic.version = 11 : i64} {
  func.func @gcn_layer1_kernel(%arg0: i32, %arg1: memref<5xi32, #tpu.memory_space<smem>>, %arg2: memref<5xi32, #tpu.memory_space<smem>>, %arg3: memref<5xi32, #tpu.memory_space<smem>>, %arg4: memref<5xi32, #tpu.memory_space<smem>>, %arg5: memref<128x128xbf16, #tpu.memory_space<vmem>>, %arg6: memref<128x128xbf16, #tpu.memory_space<vmem>>, %arg7: memref<128x128xbf16, #tpu.memory_space<vmem>>, %arg8: memref<8x128xf32, #tpu.memory_space<vmem>>, %arg9: memref<128x128xbf16, #tpu.memory_space<vmem>>, %arg10: memref<128x128xf32, #tpu.memory_space<vmem>>) attributes {dimension_semantics = [#tpu.dimension_semantics<arbitrary>], iteration_bounds = array<i64: 5>, scalar_prefetch = 4 : i64, scratch_operands = 1 : i64, tpu.core_type = #tpu.core_type<tc>, window_params = [{transform_indices = @transform_0, window_bounds = array<i64: 128, 128>}, {transform_indices = @transform_1, window_bounds = array<i64: 128, 128>}, {pipeline_mode = #tpu.pipeline_mode<synchronous>, transform_indices = @transform_2, window_bounds = array<i64: 128, 128>}, {pipeline_mode = #tpu.pipeline_mode<synchronous>, transform_indices = @transform_3, window_bounds = array<i64: 8, 128>}, {transform_indices = @transform_4, window_bounds = array<i64: 128, 128>}]} {
    %0 = arith.index_cast %arg0 : i32 to index
    %1 = memref.load %arg3[%0] : memref<5xi32, #tpu.memory_space<smem>>
    %c1_i32 = arith.constant 1 : i32
    %2 = arith.cmpi eq, %1, %c1_i32 : i32
    %3 = arith.extui %2 : i1 to i32
    %c0_i32 = arith.constant 0 : i32
    %4 = arith.cmpi ne, %3, %c0_i32 : i32
    scf.if %4 {
      %cst_9 = arith.constant 0.000000e+00 : f32
      %16 = vector.broadcast %cst_9 : f32 to vector<128x128xf32>
      %c0_10 = arith.constant 0 : index
      %c0_11 = arith.constant 0 : index
      %17 = vector.load %arg10[%c0_10, %c0_11] : memref<128x128xf32, #tpu.memory_space<vmem>>, vector<128x128xf32>
      tpu.vector_store %arg10[%c0_10, %c0_11], %16 {strides = array<i32>} : memref<128x128xf32, #tpu.memory_space<vmem>>, vector<128x128xf32>,
    } else {
    }
    %c0 = arith.constant 0 : index
    %c0_0 = arith.constant 0 : index
    %5 = vector.load %arg10[%c0, %c0_0] : memref<128x128xf32, #tpu.memory_space<vmem>>, vector<128x128xf32>
    %c0_1 = arith.constant 0 : index
    %c0_2 = arith.constant 0 : index
    %6 = vector.load %arg5[%c0_1, %c0_2] : memref<128x128xbf16, #tpu.memory_space<vmem>>, vector<128x128xbf16>
    %c0_3 = arith.constant 0 : index
    %c0_4 = arith.constant 0 : index
    %7 = vector.load %arg6[%c0_3, %c0_4] : memref<128x128xbf16, #tpu.memory_space<vmem>>, vector<128x128xbf16>
    %cst = arith.constant dense<0.000000e+00> : vector<128x128xf32>
    %8 = tpu.matmul %6, %7, %cst {dimension_numbers = #tpu.dot_dimension_numbers<[1], [0], [0], [1], [0, 0, 1, 1], [], []>} : vector<128x128xbf16>, vector<128x128xbf16>, vector<128x128xf32> -> vector<128x128xf32>
    %9 = arith.addf %5, %8 : vector<128x128xf32>
    %c0_5 = arith.constant 0 : index
    %c0_6 = arith.constant 0 : index
    %10 = vector.load %arg10[%c0_5, %c0_6] : memref<128x128xf32, #tpu.memory_space<vmem>>, vector<128x128xf32>
    tpu.vector_store %arg10[%c0_5, %c0_6], %9 {strides = array<i32>} : memref<128x128xf32, #tpu.memory_space<vmem>>, vector<128x128xf32>,
    %11 = arith.index_cast %arg0 : i32 to index
    %12 = memref.load %arg4[%11] : memref<5xi32, #tpu.memory_space<smem>>
    %c1_i32_7 = arith.constant 1 : i32
    %13 = arith.cmpi eq, %12, %c1_i32_7 : i32
    %14 = arith.extui %13 : i1 to i32
    %c0_i32_8 = arith.constant 0 : i32
    %15 = arith.cmpi ne, %14, %c0_i32_8 : i32
    scf.if %15 {
      %c0_9 = arith.constant 0 : index
      %c0_10 = arith.constant 0 : index
      %16 = vector.load %arg10[%c0_9, %c0_10] : memref<128x128xf32, #tpu.memory_space<vmem>>, vector<128x128xf32>
      %c0_11 = arith.constant 0 : index
      %c0_12 = arith.constant 0 : index
      %17 = vector.load %arg8[%c0_11, %c0_12] : memref<8x128xf32, #tpu.memory_space<vmem>>, vector<8x128xf32>
      %18 = vector.extract_strided_slice %17 {offsets = [0, 0], sizes = [1, 128], strides = [1, 1]} : vector<8x128xf32> to vector<1x128xf32>
      %19 = vector.broadcast %18 : vector<1x128xf32> to vector<128x128xf32>
      %20 = arith.addf %16, %19 : vector<128x128xf32>
      %cst_13 = arith.constant 0.000000e+00 : f32
      %21 = vector.broadcast %cst_13 : f32 to vector<128x128xf32>
      %22 = arith.maximumf %20, %21 : vector<128x128xf32>
      %23 = arith.truncf %22 : vector<128x128xf32> to vector<128x128xbf16>
      %c0_14 = arith.constant 0 : index
      %c0_15 = arith.constant 0 : index
      %24 = vector.load %arg7[%c0_14, %c0_15] : memref<128x128xbf16, #tpu.memory_space<vmem>>, vector<128x128xbf16>
      %cst_16 = arith.constant dense<0.000000e+00> : vector<128x128xf32>
      %25 = tpu.matmul %23, %24, %cst_16 {dimension_numbers = #tpu.dot_dimension_numbers<[1], [0], [0], [1], [0, 0, 1, 1], [], []>} : vector<128x128xbf16>, vector<128x128xbf16>, vector<128x128xf32> -> vector<128x128xf32>
      %26 = arith.truncf %25 : vector<128x128xf32> to vector<128x128xbf16>
      %c0_17 = arith.constant 0 : index
      %c0_18 = arith.constant 0 : index
      %27 = vector.load %arg9[%c0_17, %c0_18] : memref<128x128xbf16, #tpu.memory_space<vmem>>, vector<128x128xbf16>
      tpu.vector_store %arg9[%c0_17, %c0_18], %26 {strides = array<i32>} : memref<128x128xbf16, #tpu.memory_space<vmem>>, vector<128x128xbf16>,
    } else {
    }
    return
  }
  func.func @transform_0(%arg0: i32, %arg1: memref<5xi32, #tpu.memory_space<smem>>, %arg2: memref<5xi32, #tpu.memory_space<smem>>, %arg3: memref<5xi32, #tpu.memory_space<smem>>, %arg4: memref<5xi32, #tpu.memory_space<smem>>) -> (i32, i32) {
    %0 = arith.index_cast %arg0 : i32 to index
    %1 = memref.load %arg1[%0] : memref<5xi32, #tpu.memory_space<smem>>
    %2 = arith.index_cast %arg0 : i32 to index
    %3 = memref.load %arg2[%2] : memref<5xi32, #tpu.memory_space<smem>>
    %c0_i32 = arith.constant 0 : i32
    return %1, %3 : i32, i32
  }
  func.func @transform_1(%arg0: i32, %arg1: memref<5xi32, #tpu.memory_space<smem>>, %arg2: memref<5xi32, #tpu.memory_space<smem>>, %arg3: memref<5xi32, #tpu.memory_space<smem>>, %arg4: memref<5xi32, #tpu.memory_space<smem>>) -> (i32, i32) {
    %0 = arith.index_cast %arg0 : i32 to index
    %1 = memref.load %arg2[%0] : memref<5xi32, #tpu.memory_space<smem>>
    %c0_i32 = arith.constant 0 : i32
    %c0_i32_0 = arith.constant 0 : i32
    return %1, %c0_i32 : i32, i32
  }
  func.func @transform_2(%arg0: i32, %arg1: memref<5xi32, #tpu.memory_space<smem>>, %arg2: memref<5xi32, #tpu.memory_space<smem>>, %arg3: memref<5xi32, #tpu.memory_space<smem>>, %arg4: memref<5xi32, #tpu.memory_space<smem>>) -> (i32, i32) {
    %c0_i32 = arith.constant 0 : i32
    %c0_i32_0 = arith.constant 0 : i32
    %c0_i32_1 = arith.constant 0 : i32
    return %c0_i32, %c0_i32_0 : i32, i32
  }
  func.func @transform_3(%arg0: i32, %arg1: memref<5xi32, #tpu.memory_space<smem>>, %arg2: memref<5xi32, #tpu.memory_space<smem>>, %arg3: memref<5xi32, #tpu.memory_space<smem>>, %arg4: memref<5xi32, #tpu.memory_space<smem>>) -> (i32, i32) {
    %c0_i32 = arith.constant 0 : i32
    %c0_i32_0 = arith.constant 0 : i32
    %c0_i32_1 = arith.constant 0 : i32
    return %c0_i32, %c0_i32_0 : i32, i32
  }
  func.func @transform_4(%arg0: i32, %arg1: memref<5xi32, #tpu.memory_space<smem>>, %arg2: memref<5xi32, #tpu.memory_space<smem>>, %arg3: memref<5xi32, #tpu.memory_space<smem>>, %arg4: memref<5xi32, #tpu.memory_space<smem>>) -> (i32, i32) {
    %0 = arith.index_cast %arg0 : i32 to index
    %1 = memref.load %arg1[%0] : memref<5xi32, #tpu.memory_space<smem>>
    %c0_i32 = arith.constant 0 : i32
    %c0_i32_0 = arith.constant 0 : i32
    return %1, %c0_i32 : i32, i32
  }
}

module attributes {stable_mosaic.version = 11 : i64} {
  func.func @gcn_layer2_pool_kernel(%arg0: i32, %arg1: memref<5xi32, #tpu.memory_space<smem>>, %arg2: memref<5xi32, #tpu.memory_space<smem>>, %arg3: memref<5xi32, #tpu.memory_space<smem>>, %arg4: memref<5xi32, #tpu.memory_space<smem>>, %arg5: memref<128x128xbf16, #tpu.memory_space<vmem>>, %arg6: memref<128x128xbf16, #tpu.memory_space<vmem>>, %arg7: memref<8x128xbf16, #tpu.memory_space<vmem>>, %arg8: memref<8x128xf32, #tpu.memory_space<vmem>>, %arg9: memref<8x128xf32, #tpu.memory_space<vmem>>, %arg10: memref<8x128xf32, #tpu.memory_space<vmem>>, %arg11: memref<128x128xf32, #tpu.memory_space<vmem>>) attributes {dimension_semantics = [#tpu.dimension_semantics<arbitrary>], iteration_bounds = array<i64: 5>, scalar_prefetch = 4 : i64, scratch_operands = 1 : i64, tpu.core_type = #tpu.core_type<tc>, window_params = [{transform_indices = @transform_0, window_bounds = array<i64: 128, 128>}, {transform_indices = @transform_1, window_bounds = array<i64: 128, 128>}, {transform_indices = @transform_2, window_bounds = array<i64: 8, 128>}, {pipeline_mode = #tpu.pipeline_mode<synchronous>, transform_indices = @transform_3, window_bounds = array<i64: 8, 128>}, {pipeline_mode = #tpu.pipeline_mode<synchronous>, transform_indices = @transform_4, window_bounds = array<i64: 8, 128>}, {pipeline_mode = #tpu.pipeline_mode<synchronous>, transform_indices = @transform_5, window_bounds = array<i64: 8, 128>}]} {
    %c0_i32 = arith.constant 0 : i32
    %0 = arith.cmpi eq, %arg0, %c0_i32 : i32
    %1 = arith.extui %0 : i1 to i32
    %c0_i32_0 = arith.constant 0 : i32
    %2 = arith.cmpi ne, %1, %c0_i32_0 : i32
    scf.if %2 {
      %cst_12 = arith.constant 0.000000e+00 : f32
      %22 = vector.broadcast %cst_12 : f32 to vector<8x128xf32>
      %c0_13 = arith.constant 0 : index
      %c0_14 = arith.constant 0 : index
      %23 = vector.load %arg10[%c0_13, %c0_14] : memref<8x128xf32, #tpu.memory_space<vmem>>, vector<8x128xf32>
      tpu.vector_store %arg10[%c0_13, %c0_14], %22 {strides = array<i32>} : memref<8x128xf32, #tpu.memory_space<vmem>>, vector<8x128xf32>,
    } else {
    }
    %3 = arith.index_cast %arg0 : i32 to index
    %4 = memref.load %arg3[%3] : memref<5xi32, #tpu.memory_space<smem>>
    %c1_i32 = arith.constant 1 : i32
    %5 = arith.cmpi eq, %4, %c1_i32 : i32
    %6 = arith.extui %5 : i1 to i32
    %c0_i32_1 = arith.constant 0 : i32
    %7 = arith.cmpi ne, %6, %c0_i32_1 : i32
    scf.if %7 {
      %cst_12 = arith.constant 0.000000e+00 : f32
      %22 = vector.broadcast %cst_12 : f32 to vector<128x128xf32>
      %c0_13 = arith.constant 0 : index
      %c0_14 = arith.constant 0 : index
      %23 = vector.load %arg11[%c0_13, %c0_14] : memref<128x128xf32, #tpu.memory_space<vmem>>, vector<128x128xf32>
      tpu.vector_store %arg11[%c0_13, %c0_14], %22 {strides = array<i32>} : memref<128x128xf32, #tpu.memory_space<vmem>>, vector<128x128xf32>,
    } else {
    }
    %c0 = arith.constant 0 : index
    %c0_2 = arith.constant 0 : index
    %8 = vector.load %arg11[%c0, %c0_2] : memref<128x128xf32, #tpu.memory_space<vmem>>, vector<128x128xf32>
    %c0_3 = arith.constant 0 : index
    %c0_4 = arith.constant 0 : index
    %9 = vector.load %arg5[%c0_3, %c0_4] : memref<128x128xbf16, #tpu.memory_space<vmem>>, vector<128x128xbf16>
    %c0_5 = arith.constant 0 : index
    %c0_6 = arith.constant 0 : index
    %10 = vector.load %arg6[%c0_5, %c0_6] : memref<128x128xbf16, #tpu.memory_space<vmem>>, vector<128x128xbf16>
    %cst = arith.constant dense<0.000000e+00> : vector<128x128xf32>
    %11 = tpu.matmul %9, %10, %cst {dimension_numbers = #tpu.dot_dimension_numbers<[1], [0], [0], [1], [0, 0, 1, 1], [], []>} : vector<128x128xbf16>, vector<128x128xbf16>, vector<128x128xf32> -> vector<128x128xf32>
    %12 = arith.addf %8, %11 : vector<128x128xf32>
    %c0_7 = arith.constant 0 : index
    %c0_8 = arith.constant 0 : index
    %13 = vector.load %arg11[%c0_7, %c0_8] : memref<128x128xf32, #tpu.memory_space<vmem>>, vector<128x128xf32>
    tpu.vector_store %arg11[%c0_7, %c0_8], %12 {strides = array<i32>} : memref<128x128xf32, #tpu.memory_space<vmem>>, vector<128x128xf32>,
    %14 = arith.index_cast %arg0 : i32 to index
    %15 = memref.load %arg4[%14] : memref<5xi32, #tpu.memory_space<smem>>
    %c1_i32_9 = arith.constant 1 : i32
    %16 = arith.cmpi eq, %15, %c1_i32_9 : i32
    %17 = arith.extui %16 : i1 to i32
    %c0_i32_10 = arith.constant 0 : i32
    %18 = arith.cmpi ne, %17, %c0_i32_10 : i32
    scf.if %18 {
      %c0_12 = arith.constant 0 : index
      %c0_13 = arith.constant 0 : index
      %22 = vector.load %arg11[%c0_12, %c0_13] : memref<128x128xf32, #tpu.memory_space<vmem>>, vector<128x128xf32>
      %c0_14 = arith.constant 0 : index
      %c0_15 = arith.constant 0 : index
      %23 = vector.load %arg8[%c0_14, %c0_15] : memref<8x128xf32, #tpu.memory_space<vmem>>, vector<8x128xf32>
      %24 = vector.extract_strided_slice %23 {offsets = [0, 0], sizes = [1, 128], strides = [1, 1]} : vector<8x128xf32> to vector<1x128xf32>
      %25 = vector.broadcast %24 : vector<1x128xf32> to vector<128x128xf32>
      %26 = arith.addf %22, %25 : vector<128x128xf32>
      %c0_16 = arith.constant 0 : index
      %c0_17 = arith.constant 0 : index
      %27 = vector.load %arg10[%c0_16, %c0_17] : memref<8x128xf32, #tpu.memory_space<vmem>>, vector<8x128xf32>
      %c0_18 = arith.constant 0 : index
      %c0_19 = arith.constant 0 : index
      %28 = vector.load %arg7[%c0_18, %c0_19] : memref<8x128xbf16, #tpu.memory_space<vmem>>, vector<8x128xbf16>
      %29 = arith.truncf %26 : vector<128x128xf32> to vector<128x128xbf16>
      %cst_20 = arith.constant dense<0.000000e+00> : vector<8x128xf32>
      %30 = tpu.matmul %28, %29, %cst_20 {dimension_numbers = #tpu.dot_dimension_numbers<[1], [0], [0], [1], [0, 0, 1, 1], [], []>} : vector<8x128xbf16>, vector<128x128xbf16>, vector<8x128xf32> -> vector<8x128xf32>
      %31 = arith.addf %27, %30 : vector<8x128xf32>
      %c0_21 = arith.constant 0 : index
      %c0_22 = arith.constant 0 : index
      %32 = vector.load %arg10[%c0_21, %c0_22] : memref<8x128xf32, #tpu.memory_space<vmem>>, vector<8x128xf32>
      tpu.vector_store %arg10[%c0_21, %c0_22], %31 {strides = array<i32>} : memref<8x128xf32, #tpu.memory_space<vmem>>, vector<8x128xf32>,
    } else {
    }
    %c4_i32 = arith.constant 4 : i32
    %19 = arith.cmpi eq, %arg0, %c4_i32 : i32
    %20 = arith.extui %19 : i1 to i32
    %c0_i32_11 = arith.constant 0 : i32
    %21 = arith.cmpi ne, %20, %c0_i32_11 : i32
    scf.if %21 {
      %c0_12 = arith.constant 0 : index
      %c0_13 = arith.constant 0 : index
      %22 = vector.load %arg10[%c0_12, %c0_13] : memref<8x128xf32, #tpu.memory_space<vmem>>, vector<8x128xf32>
      %c0_14 = arith.constant 0 : index
      %c0_15 = arith.constant 0 : index
      %23 = vector.load %arg9[%c0_14, %c0_15] : memref<8x128xf32, #tpu.memory_space<vmem>>, vector<8x128xf32>
      %24 = vector.extract_strided_slice %23 {offsets = [0, 0], sizes = [1, 128], strides = [1, 1]} : vector<8x128xf32> to vector<1x128xf32>
      %25 = vector.broadcast %24 : vector<1x128xf32> to vector<8x128xf32>
      %26 = arith.addf %22, %25 : vector<8x128xf32>
      %c0_16 = arith.constant 0 : index
      %c0_17 = arith.constant 0 : index
      %27 = vector.load %arg10[%c0_16, %c0_17] : memref<8x128xf32, #tpu.memory_space<vmem>>, vector<8x128xf32>
      tpu.vector_store %arg10[%c0_16, %c0_17], %26 {strides = array<i32>} : memref<8x128xf32, #tpu.memory_space<vmem>>, vector<8x128xf32>,
    } else {
    }
    return
  }
  func.func @transform_0(%arg0: i32, %arg1: memref<5xi32, #tpu.memory_space<smem>>, %arg2: memref<5xi32, #tpu.memory_space<smem>>, %arg3: memref<5xi32, #tpu.memory_space<smem>>, %arg4: memref<5xi32, #tpu.memory_space<smem>>) -> (i32, i32) {
    %0 = arith.index_cast %arg0 : i32 to index
    %1 = memref.load %arg1[%0] : memref<5xi32, #tpu.memory_space<smem>>
    %2 = arith.index_cast %arg0 : i32 to index
    %3 = memref.load %arg2[%2] : memref<5xi32, #tpu.memory_space<smem>>
    %c0_i32 = arith.constant 0 : i32
    return %1, %3 : i32, i32
  }
  func.func @transform_1(%arg0: i32, %arg1: memref<5xi32, #tpu.memory_space<smem>>, %arg2: memref<5xi32, #tpu.memory_space<smem>>, %arg3: memref<5xi32, #tpu.memory_space<smem>>, %arg4: memref<5xi32, #tpu.memory_space<smem>>) -> (i32, i32) {
    %0 = arith.index_cast %arg0 : i32 to index
    %1 = memref.load %arg2[%0] : memref<5xi32, #tpu.memory_space<smem>>
    %c0_i32 = arith.constant 0 : i32
    %c0_i32_0 = arith.constant 0 : i32
    return %1, %c0_i32 : i32, i32
  }
  func.func @transform_2(%arg0: i32, %arg1: memref<5xi32, #tpu.memory_space<smem>>, %arg2: memref<5xi32, #tpu.memory_space<smem>>, %arg3: memref<5xi32, #tpu.memory_space<smem>>, %arg4: memref<5xi32, #tpu.memory_space<smem>>) -> (i32, i32) {
    %0 = arith.index_cast %arg0 : i32 to index
    %1 = memref.load %arg1[%0] : memref<5xi32, #tpu.memory_space<smem>>
    %c0_i32 = arith.constant 0 : i32
    %c0_i32_0 = arith.constant 0 : i32
    return %c0_i32, %1 : i32, i32
  }
  func.func @transform_3(%arg0: i32, %arg1: memref<5xi32, #tpu.memory_space<smem>>, %arg2: memref<5xi32, #tpu.memory_space<smem>>, %arg3: memref<5xi32, #tpu.memory_space<smem>>, %arg4: memref<5xi32, #tpu.memory_space<smem>>) -> (i32, i32) {
    %c0_i32 = arith.constant 0 : i32
    %c0_i32_0 = arith.constant 0 : i32
    %c0_i32_1 = arith.constant 0 : i32
    return %c0_i32, %c0_i32_0 : i32, i32
  }
  func.func @transform_4(%arg0: i32, %arg1: memref<5xi32, #tpu.memory_space<smem>>, %arg2: memref<5xi32, #tpu.memory_space<smem>>, %arg3: memref<5xi32, #tpu.memory_space<smem>>, %arg4: memref<5xi32, #tpu.memory_space<smem>>) -> (i32, i32) {
    %c0_i32 = arith.constant 0 : i32
    %c0_i32_0 = arith.constant 0 : i32
    %c0_i32_1 = arith.constant 0 : i32
    return %c0_i32, %c0_i32_0 : i32, i32
  }
  func.func @transform_5(%arg0: i32, %arg1: memref<5xi32, #tpu.memory_space<smem>>, %arg2: memref<5xi32, #tpu.memory_space<smem>>, %arg3: memref<5xi32, #tpu.memory_space<smem>>, %arg4: memref<5xi32, #tpu.memory_space<smem>>) -> (i32, i32) {
    %c0_i32 = arith.constant 0 : i32
    %c0_i32_0 = arith.constant 0 : i32
    %c0_i32_1 = arith.constant 0 : i32
    return %c0_i32, %c0_i32_0 : i32, i32
  }
}

</mosaic_0001>

<bundles_post_ra>
// kernel: _impl.3
= control target key start
LH: loop header
LB: loop body
LE: loop exit
PB: predicated region body
PF: predicated region fallthrough
CT: control target
= control target key end

     0   :  { %s605_s9 = smov 0   ;;  %s653_s0 = inlined_call_operand.vmem [shape: bf16[384,128], index: 0, kind: input, shape index: {}]   ;;  %s654_s1 = inlined_call_operand.vmem [shape: bf16[128,128], index: 1, kind: input, shape index: {}]   ;;  %s655_s2 = inlined_call_operand.vmem [shape: bf16[384,128], index: 2, kind: output, shape index: {}]  }
   0x1 LB: > { %s412_s10 = sadd.s32 4294967295, %s588_s9   ;;  %p416_p0 = scmp.ge.s32.totalorder %s588_s9, 1  ;;  %s588_s9 = sphi %s605_s9, %s12_s9  }
   0x2   : > { %p113_p1 = scmp.lt.s32.totalorder %s588_s9, 4 }
   0x4   : > { %p114_p2 = pnand %p416_p0, %p113_p1 }
   0x5   : > { %s417_s19 = sshll.u32 (!%p114_p2), %s412_s10, 4 }
   0x6   : > { %117 = sbr.rel (%p114_p2) target bundleno = 204 (0xcc), region = 28  ;;  %p136_p3 = scmp.lt.s32.totalorder (!%p114_p2), %s417_s19, 47 }
   0xb   : > { %v502_v0 = vld [vmem:[%s654_s1 + $0x38] sm:$0xff]  ;;  %v501_v1 = vld [vmem:[%s654_s1 + $0x30] sm:$0xff]  ;;  %v500_v2 = vld [vmem:[%s654_s1 + $0x28] sm:$0xff]  ;;  %s657_s19 = smov (!%p136_p3, %s417_s19), 47 }
   0xc   : > { %275 = vmatpush.bf16.msra.mxu0 %v502_v0  ;;  %550 = vmatpush.bf16.msra.mxu1 %v502_v0  ;;  %v499_v3 = vld [vmem:[%s654_s1 + $0x20] sm:$0xff]  ;;  %v498_v4 = vld [vmem:[%s654_s1 + $0x18] sm:$0xff]  ;;  %v497_v5 = vld [vmem:[%s654_s1 + $0x10] sm:$0xff]  ;;  %s418_s26 = sshll.u32 %s657_s19, 2 }
   0xd   : > { %551 = vmatpush.bf16.msra.mxu2 %v502_v0  ;;  %552 = vmatpush.bf16.msra.mxu3 %v502_v0  ;;  %v496_v6 = vld [vmem:[%s654_s1 + $0x8] sm:$0xff]  ;;  %v495_v7 = vld [vmem:[%s654_s1] sm:$0xff]  ;;  %s139_s3 = scalar_lea.vmem %s653_s0, %s418_s26  ;;  %s145_s6 = scalar_lea.vmem %s655_s2, %s418_s26 }
   0xe   : > { %v487_v8 = vld [vmem:[%s139_s3] sm:$0xff]  ;;  %v489_v9 = vld [vmem:[%s139_s3 + $0x10] sm:$0xff]  ;;  %v488_v12 = vld [vmem:[%s139_s3 + $0x8] sm:$0xff] }
   0xf   : > { %v491_v10 = vld [vmem:[%s139_s3 + $0x20] sm:$0xff]  ;;  %v493_v11 = vld [vmem:[%s139_s3 + $0x30] sm:$0xff]  ;;  %v490_v13 = vld [vmem:[%s139_s3 + $0x18] sm:$0xff] }
  0x10   : > { %276 = vmatpush.bf16.msra.mxu0 %v501_v1  ;;  %553 = vmatpush.bf16.msra.mxu1 %v501_v1  ;;  %v492_v14 = vld [vmem:[%s139_s3 + $0x28] sm:$0xff]  ;;  %v494_v15 = vld [vmem:[%s139_s3 + $0x38] sm:$0xff] }
  0x11   : > { %554 = vmatpush.bf16.msra.mxu2 %v501_v1  ;;  %555 = vmatpush.bf16.msra.mxu3 %v501_v1 }
  0x14   : > { %277 = vmatpush.bf16.msra.mxu0 %v500_v2  ;;  %556 = vmatpush.bf16.msra.mxu1 %v500_v2 }
  0x15   : > { %557 = vmatpush.bf16.msra.mxu2 %v500_v2  ;;  %558 = vmatpush.bf16.msra.mxu3 %v500_v2 }
  0x18   : > { %278 = vmatpush.bf16.msra.mxu0 %v499_v3  ;;  %559 = vmatpush.bf16.msra.mxu1 %v499_v3 }
  0x19   : > { %560 = vmatpush.bf16.msra.mxu2 %v499_v3  ;;  %561 = vmatpush.bf16.msra.mxu3 %v499_v3 }
  0x1c   : > { %279 = vmatpush.bf16.msra.mxu0 %v498_v4  ;;  %562 = vmatpush.bf16.msra.mxu1 %v498_v4 }
  0x1d   : > { %563 = vmatpush.bf16.msra.mxu2 %v498_v4  ;;  %564 = vmatpush.bf16.msra.mxu3 %v498_v4 }
  0x20   : > { %280 = vmatpush.bf16.msra.mxu0 %v497_v5  ;;  %565 = vmatpush.bf16.msra.mxu1 %v497_v5 }
  0x21   : > { %566 = vmatpush.bf16.msra.mxu2 %v497_v5  ;;  %567 = vmatpush.bf16.msra.mxu3 %v497_v5 }
  0x24   : > { %281 = vmatpush.bf16.msra.mxu0 %v496_v6  ;;  %568 = vmatpush.bf16.msra.mxu1 %v496_v6 }
  0x25   : > { %569 = vmatpush.bf16.msra.mxu2 %v496_v6  ;;  %570 = vmatpush.bf16.msra.mxu3 %v496_v6 }
  0x28   : > { %282 = vmatpush.bf16.msra.mxu0 %v495_v7  ;;  %571 = vmatpush.bf16.msra.mxu1 %v495_v7 }
  0x29   : > { %572 = vmatpush.bf16.msra.mxu2 %v495_v7  ;;  %573 = vmatpush.bf16.msra.mxu3 %v495_v7 }
  0x2b   : > { %283 = vmatmul.bf16.vlgmr.msra.gmra.mxu0 %v487_v8  ;;  %293 = vmatmul.bf16.vlgmr.msra.gmra.mxu1 %v489_v9 }
  0x2c   : > { %303 = vmatmul.bf16.vlgmr.msra.gmra.mxu2 %v491_v10  ;;  %313 = vmatmul.bf16.vlgmr.msra.gmra.mxu3 %v493_v11 }
  0x3b   : > { %288 = vmatmul.bf16.gmra.mxu0 %v488_v12  ;;  %298 = vmatmul.bf16.gmra.mxu1 %v490_v13 }
  0x3c   : > { %308 = vmatmul.bf16.gmra.mxu2 %v492_v14  ;;  %318 = vmatmul.bf16.gmra.mxu3 %v494_v15 }
  0xa8   : > { %v284_v16 = vpop.f32.mrf.mxu0  ;;  %v294_v17 = vpop.f32.mrf.mxu1 }
  0xaf   : > { %v304_v18 = vpop.f32.mrf.mxu2  ;;  %v314_v19 = vpop.f32.mrf.mxu3 }
  0xb0   : > { %v286_v20 = vpop.f32.mrf.mxu0  ;;  %v296_v21 = vpop.f32.mrf.mxu1 }
  0xb1   : > { %v506_v22 = vpack.c.bf16 %v286_v20, %v284_v16  ;;  %v516_v23 = vpack.c.bf16 %v296_v21, %v294_v17 }
  0xb3   : > { %507 = vst [vmem:[%s145_s6] sm:$0xff] %v506_v22  }
  0xb4   : > { %544 = vst [vmem:[%s145_s6 + $0x10] sm:$0xff] %v516_v23  }
  0xb7   : > { %v306_v24 = vpop.f32.mrf.mxu2  ;;  %v316_v25 = vpop.f32.mrf.mxu3 }
  0xb8   : > { %v526_v26 = vpack.c.bf16 %v306_v24, %v304_v18  ;;  %v536_v27 = vpack.c.bf16 %v316_v25, %v314_v19  ;;  %v289_v28 = vpop.f32.mrf.mxu0  ;;  %v299_v29 = vpop.f32.mrf.mxu1 }
  0xba   : > { %546 = vst [vmem:[%s145_s6 + $0x20] sm:$0xff] %v526_v26  }
  0xbb   : > { %548 = vst [vmem:[%s145_s6 + $0x30] sm:$0xff] %v536_v27  }
  0xbf   : > { %v309_v30 = vpop.f32.mrf.mxu2  ;;  %v319_v31 = vpop.f32.mrf.mxu3 }
  0xc0   : > { %v291_v32 = vpop.f32.mrf.mxu0  ;;  %v301_v33 = vpop.f32.mrf.mxu1 }
  0xc1   : > { %v511_v34 = vpack.c.bf16 %v291_v32, %v289_v28  ;;  %v521_v35 = vpack.c.bf16 %v301_v33, %v299_v29 }
  0xc3   : > { %543 = vst [vmem:[%s145_s6 + $0x8] sm:$0xff] %v511_v34  }
  0xc4   : > { %545 = vst [vmem:[%s145_s6 + $0x18] sm:$0xff] %v521_v35  }
  0xc7   : > { %v311_v36 = vpop.f32.mrf.mxu2  ;;  %v321_v37 = vpop.f32.mrf.mxu3 }
  0xc8   : > { %v531_v38 = vpack.c.bf16 %v311_v36, %v309_v30  ;;  %v541_v39 = vpack.c.bf16 %v321_v37, %v319_v31 }
  0xca   : > { %547 = vst [vmem:[%s145_s6 + $0x28] sm:$0xff] %v531_v38  }
  0xcb   : > { %549 = vst [vmem:[%s145_s6 + $0x38] sm:$0xff] %v541_v39  }
  0xcc PF: > { %s12_s9 = sadd.s32 1, %s588_s9  }
  0xcd   : > { %p9_p4 = scmp.ge.s32.totalorder %s12_s9, 5  }
  0xcf   :  { %11 = sbr.rel (!%p9_p4) target bundleno = 1 (0x1), region = 58 }

// kernel: _impl.4
= control target key start
LH: loop header
LB: loop body
LE: loop exit
PB: predicated region body
PF: predicated region fallthrough
CT: control target
= control target key end

     0   :  { %s1247_s11 = smov [#allocation4]   ;;  %s1248_s12 = smov [#allocation5]   ;;  %s1467_s0 = inlined_call_operand.vmem [shape: s32[5], index: 0, kind: input, shape index: {}]   ;;  %s1468_s4 = inlined_call_operand.vmem [shape: bf16[384,384], index: 4, kind: input, shape index: {}]   ;;  %s1469_s5 = inlined_call_operand.vmem [shape: bf16[384,128], index: 5, kind: input, shape index: {}]   ;;  %s1470_s6 = inlined_call_operand.vmem [shape: bf16[128,128], index: 6, kind: input, shape index: {}]   ;;  %s1471_s7 = inlined_call_operand.vmem [shape: f32[8,128], index: 7, kind: input, shape index: {}]   ;;  %s1472_s8 = inlined_call_operand.vmem [shape: bf16[384,128], index: 8, kind: output, shape index: {}]   ;;  %s1473_s1 = inlined_call_operand.vmem [shape: s32[5], index: 1, kind: input, shape index: {}]   ;;  %s1474_s2 = inlined_call_operand.vmem [shape: s32[5], index: 2, kind: input, shape index: {}]   ;;  %s1475_s3 = inlined_call_operand.vmem [shape: s32[5], index: 3, kind: input, shape index: {}]  }
   0x1   :  { %s14_s29 = sshll.u32 %s1467_s0, 4  ;;  %s19_s10 = sshll.u32 %s1473_s1, 4  ;;  %s15_s29 = int_to_ptr.vmem [resolvable:$true] %s14_s29  ;;  %s20_s10 = int_to_ptr.vmem [resolvable:$true] %s19_s10 }
   0x2   :  { %17 = dma.vmem_to_smem %s15_s29, 16, %s1247_s11, [#allocation3] }
   0x3   :  { %22 = dma.vmem_to_smem %s20_s10, 16, %s1248_s12, [#allocation3] }
   0x4   :  { %s24_s15 = sshll.u32 %s1474_s2, 4  ;;  %s29_s18 = sshll.u32 %s1475_s3, 4  ;;  %s25_s15 = int_to_ptr.vmem [resolvable:$true] %s24_s15  ;;  %s30_s18 = int_to_ptr.vmem [resolvable:$true] %s29_s18 }
   0x5   :  { %s1249_s0 = smov [#allocation6]   ;;  %s1250_s19 = smov [#allocation7]  }
   0x6   :  { %27 = dma.vmem_to_smem %s25_s15, 16, %s1249_s0, [#allocation3] }
   0x7   :  { %32 = dma.vmem_to_smem %s30_s18, 16, %s1250_s19, [#allocation3] }
   0x8   :  { %1233 = dma.done.wait [#allocation3], 64 }
   0x9   :  { %1234 = vsyncadd [#allocation3], 4294967232 }
   0xa   :  { %35 = sfence }
   0xb   :  { %s1309_s1 = smov 0   ;;  %s1311_s20 = smov 0  }
   0xc   :  { %s1313_s21 = smov 0  }
   0xd LB: > { %s1325_s2 = sadd.s32 4294967295, %s1245_s21   ;;  %s1328_s3 = sadd.s32 1, %s1245_s21   ;;  %s1245_s21 = sphi %s1313_s21, %s1478_s21   ;;  %s1241_s20 = sphi %s1311_s20, %s1477_s20   ;;  %s1237_s1 = sphi %s1309_s1, %s1476_s1  }
   0xe   : > { %s45_s22 = sld [smem:[#allocation4 + %s1245_s21]]  ;;  %p61_p0 = scmp.ne.s32.totalorder %s1241_s20, %s1237_s1 }
   0xf   : > { %s46_s23 = sld [smem:[#allocation5 + %s1245_s21]]  ;;  %p62_p1 = scmp.eq.s32.totalorder %s1245_s21, 0 }
  0x10   : > { %s47_s24 = sld [smem:[#allocation4 + %s1328_s3]]  ;;  %s54_s29 = sadd.s32 1, %s1241_s20 }
  0x11   : > { %s48_s25 = sld [smem:[#allocation5 + %s1328_s3]]  ;;  %p63_p2 = por %p62_p1, %p61_p0 }
  0x12   : > { %p913_p4 = scmp.ge.s32.totalorder %s1245_s21, 5 }
  0x16   : > { %s49_s26 = ssub.s32 %s45_s22, %s47_s24 }
  0x17   : > { %s50_s27 = ssub.s32 %s46_s23, %s48_s25  ;;  %191 = sbr.rel (%p913_p4) target bundleno = 56 (0x38), region = 24 }
  0x18   : > { %s51_s28 = sor.u32 %s50_s27, %s49_s26 }
  0x19   : > { %p52_p3 = scmp.eq.s32.totalorder %s51_s28, 0 }
  0x1b   : > { %s1339_s30 = scalar_select %p52_p3, %s1241_s20, %s54_s29  }
  0x1c   : > { %194 = sbr.rel (!%p63_p2) target bundleno = 56 (0x38), region = 28  ;;  %s199_s9 = sld [smem:[#allocation4 + %s1245_s21]] (%p63_p2) }
  0x1d   : > { %s200_s10 = sld [smem:[#allocation5 + %s1245_s21]] (%p63_p2)  ;;  %s196_s11 = sand.u32 (%p63_p2), 1, %s1241_s20  }
  0x1e   : > { %s914_s12 = sshll.u32 (%p63_p2), %s196_s11, 6 }
  0x1f   : > { %s198_s0 = scalar_lea.vmem (%p63_p2), [#allocation8], %s914_s12 }
  0x22   : > { %s1143_s13 = smul.u32 48, %s199_s9 }
  0x24   : > { %s203_s14 = sadd.s32 %s1143_s13, %s200_s10 }
  0x25   : > { %s917_s15 = sshll.u32 %s203_s14, 2 }
  0x26   : > { %s1348_s18 = scalar_lea.vmem %s1468_s4, %s917_s15 }
  0x27   : > { %v222_v0 = vld [vmem:[%s1348_s18] sm:$0xf]  ;;  %v224_v1 = vld [vmem:[%s1348_s18 + $0xc] sm:$0xf]  ;;  %v226_v2 = vld [vmem:[%s1348_s18 + $0x18] sm:$0xf] }
  0x28   : > { %223 = vst [vmem:[%s198_s0] sm:$0xf] %v222_v0  ;;  %v228_v3 = vld [vmem:[%s1348_s18 + $0x24] sm:$0xf]  ;;  %v230_v4 = vld [vmem:[%s1348_s18 + $0x30] sm:$0xf] }
  0x29   : > { %225 = vst [vmem:[%s198_s0 + $0x4] sm:$0xf] %v224_v1  ;;  %v232_v5 = vld [vmem:[%s1348_s18 + $0x3c] sm:$0xf]  ;;  %v234_v6 = vld [vmem:[%s1348_s18 + $0x48] sm:$0xf] }
  0x2a   : > { %227 = vst [vmem:[%s198_s0 + $0x8] sm:$0xf] %v226_v2  ;;  %v236_v7 = vld [vmem:[%s1348_s18 + $0x54] sm:$0xf]  ;;  %v238_v8 = vld [vmem:[%s1348_s18 + $0x60] sm:$0xf] }
  0x2b   : > { %229 = vst [vmem:[%s198_s0 + $0xc] sm:$0xf] %v228_v3  ;;  %v240_v9 = vld [vmem:[%s1348_s18 + $0x6c] sm:$0xf]  ;;  %v242_v10 = vld [vmem:[%s1348_s18 + $0x78] sm:$0xf] }
  0x2c   : > { %231 = vst [vmem:[%s198_s0 + $0x10] sm:$0xf] %v230_v4  ;;  %v244_v11 = vld [vmem:[%s1348_s18 + $0x84] sm:$0xf]  ;;  %v246_v12 = vld [vmem:[%s1348_s18 + $0x90] sm:$0xf] }
  0x2d   : > { %233 = vst [vmem:[%s198_s0 + $0x14] sm:$0xf] %v232_v5  ;;  %v248_v13 = vld [vmem:[%s1348_s18 + $0x9c] sm:$0xf]  ;;  %v250_v14 = vld [vmem:[%s1348_s18 + $0xa8] sm:$0xf] }
  0x2e   : > { %235 = vst [vmem:[%s198_s0 + $0x18] sm:$0xf] %v234_v6  ;;  %v252_v15 = vld [vmem:[%s1348_s18 + $0xb4] sm:$0xf] }
  0x2f   : > { %237 = vst [vmem:[%s198_s0 + $0x1c] sm:$0xf] %v236_v7 }
  0x30   : > { %239 = vst [vmem:[%s198_s0 + $0x20] sm:$0xf] %v238_v8 }
  0x31   : > { %241 = vst [vmem:[%s198_s0 + $0x24] sm:$0xf] %v240_v9 }
  0x32   : > { %243 = vst [vmem:[%s198_s0 + $0x28] sm:$0xf] %v242_v10 }
  0x33   : > { %245 = vst [vmem:[%s198_s0 + $0x2c] sm:$0xf] %v244_v11 }
  0x34   : > { %247 = vst [vmem:[%s198_s0 + $0x30] sm:$0xf] %v246_v12 }
  0x35   : > { %249 = vst [vmem:[%s198_s0 + $0x34] sm:$0xf] %v248_v13 }
  0x36   : > { %251 = vst [vmem:[%s198_s0 + $0x38] sm:$0xf] %v250_v14 }
  0x37   : > { %253 = vst [vmem:[%s198_s0 + $0x3c] sm:$0xf] %v252_v15 }
  0x38 PF: > { %p918_p5 = scmp.ge.s32.totalorder %s1245_s21, 1  ;;  %p319_p6 = scmp.lt.s32.totalorder %s1245_s21, 6 }
  0x3a   : > { %p320_p7 = pnand %p918_p5, %p319_p6 }
  0x3b   : > { %s326_s19 = sand.u32 (!%p320_p7), 1, %s1237_s1   ;;  %s361_s22 = sld [smem:[#allocation5 + %s1325_s2]] (!%p320_p7) }
  0x3c   : > { %323 = sbr.rel (%p320_p7) target bundleno = 479 (0x1df), region = 73  ;;  %s919_s23 = sshll.u32 (!%p320_p7), %s326_s19, 6 }
  0x3d   : > { %s369_s24 = sld [smem:[#allocation4 + %s1325_s2]] (!%p320_p7)  ;;  %s1382_s13 = scalar_lea.vmem (!%p320_p7), [#allocation8], %s919_s23 }
  0x3e   : > { %s377_s25 = sld [smem:[#allocation6 + %s1325_s2]] (!%p320_p7) }
  0x41   : > { %s920_s26 = sshll.u32 %s361_s22, 4 }
  0x42   : > { %p363_p8 = scmp.lt.s32.totalorder %s920_s26, 47 }
  0x43   : > { %s922_s27 = sshll.u32 %s369_s24, 4 }
  0x44   : > { %p371_p9 = scmp.lt.s32.totalorder %s922_s27, 47  ;;  %s1480_s26 = smov (!%p363_p8, %s920_s26), 47 }
  0x45   : > { %s921_s28 = sshll.u32 %s1480_s26, 2  ;;  %p924_p10 = scmp.ne.s32.totalorder %s377_s25, 1 }
  0x46   : > { %s1482_s27 = smov (!%p371_p9, %s922_s27), 47  ;;  %s1375_s9 = scalar_lea.vmem %s1469_s5, %s921_s28 }
  0x47   : > { %s923_s10 = sshll.u32 %s1482_s27, 2  ;;  %381 = sbr.rel (%p924_p10) target bundleno = 93 (0x5d), region = 81 }
  0x48   : > { %s1380_s1 = scalar_lea.vmem %s1472_s8, %s923_s10 }
  0x4c   : > { %v1251_v16 = vmov 0.0  }
  0x4d   : > { %382 = vst [vmem:[#allocation2 + $0x30] sm:$0xff] %v1251_v16 }
  0x4e   : > { %383 = vst [vmem:[#allocation2] sm:$0xff] %v1251_v16 }
  0x4f   : > { %384 = vst [vmem:[#allocation2 + $0x58] sm:$0xff] %v1251_v16 }
  0x50   : > { %385 = vst [vmem:[#allocation2 + $0x18] sm:$0xff] %v1251_v16 }
  0x51   : > { %386 = vst [vmem:[#allocation2 + $0x50] sm:$0xff] %v1251_v16 }
  0x52   : > { %387 = vst [vmem:[#allocation2 + $0x68] sm:$0xff] %v1251_v16 }
  0x53   : > { %388 = vst [vmem:[#allocation2 + $0x8] sm:$0xff] %v1251_v16 }
  0x54   : > { %389 = vst [vmem:[#allocation2 + $0x48] sm:$0xff] %v1251_v16 }
  0x55   : > { %390 = vst [vmem:[#allocation2 + $0x40] sm:$0xff] %v1251_v16 }
  0x56   : > { %391 = vst [vmem:[#allocation2 + $0x20] sm:$0xff] %v1251_v16 }
  0x57   : > { %392 = vst [vmem:[#allocation2 + $0x10] sm:$0xff] %v1251_v16 }
  0x58   : > { %393 = vst [vmem:[#allocation2 + $0x38] sm:$0xff] %v1251_v16 }
  0x59   : > { %394 = vst [vmem:[#allocation2 + $0x60] sm:$0xff] %v1251_v16 }
  0x5a   : > { %395 = vst [vmem:[#allocation2 + $0x70] sm:$0xff] %v1251_v16 }
  0x5b   : > { %396 = vst [vmem:[#allocation2 + $0x78] sm:$0xff] %v1251_v16 }
  0x5c   : > { %397 = vst [vmem:[#allocation2 + $0x28] sm:$0xff] %v1251_v16 }
  0x5d PF: > { %v1039_v17 = vld [vmem:[%s1375_s9 + $0x38] sm:$0xff]  ;;  %v1038_v18 = vld [vmem:[%s1375_s9 + $0x30] sm:$0xff]  ;;  %v1037_v19 = vld [vmem:[%s1375_s9 + $0x28] sm:$0xff]  ;;  %s1401_s14 = sld [smem:[#allocation7 + %s1325_s2]] }
  0x5e   : > { %542 = vmatpush.bf16.msra.mxu0 %v1039_v17  ;;  %1095 = vmatpush.bf16.msra.mxu1 %v1039_v17  ;;  %v1036_v20 = vld [vmem:[%s1375_s9 + $0x20] sm:$0xff]  ;;  %v1035_v21 = vld [vmem:[%s1375_s9 + $0x18] sm:$0xff]  ;;  %v1034_v22 = vld [vmem:[%s1375_s9 + $0x10] sm:$0xff] }
  0x5f   : > { %1096 = vmatpush.bf16.msra.mxu2 %v1039_v17  ;;  %1097 = vmatpush.bf16.msra.mxu3 %v1039_v17  ;;  %v1033_v23 = vld [vmem:[%s1375_s9 + $0x8] sm:$0xff]  ;;  %v1032_v24 = vld [vmem:[%s1375_s9] sm:$0xff]  ;;  %v1026_v26 = vld [vmem:[%s1382_s13 + $0x10] sm:$0xff] }
  0x60   : > { %v1024_v25 = vld [vmem:[%s1382_s13] sm:$0xff]  ;;  %v1030_v28 = vld [vmem:[%s1382_s13 + $0x30] sm:$0xff]  ;;  %v1025_v29 = vld [vmem:[%s1382_s13 + $0x8] sm:$0xff] }
  0x61   : > { %v1028_v27 = vld [vmem:[%s1382_s13 + $0x20] sm:$0xff]  ;;  %v1027_v30 = vld [vmem:[%s1382_s13 + $0x18] sm:$0xff]  ;;  %v1029_v31 = vld [vmem:[%s1382_s13 + $0x28] sm:$0xff] }
  0x62   : > { %543 = vmatpush.bf16.msra.mxu0 %v1038_v18  ;;  %1098 = vmatpush.bf16.msra.mxu1 %v1038_v18  ;;  %v1031_v32 = vld [vmem:[%s1382_s13 + $0x38] sm:$0xff]  ;;  %v398_v33 = vld [vmem:[#allocation2 + $0x30] sm:$0xff]  ;;  %v406_v39 = vld [vmem:[#allocation2 + $0x40] sm:$0xff] }
  0x63   : > { %1099 = vmatpush.bf16.msra.mxu2 %v1038_v18  ;;  %1100 = vmatpush.bf16.msra.mxu3 %v1038_v18  ;;  %v402_v34 = vld [vmem:[#allocation2 + $0x50] sm:$0xff]  ;;  %v410_v40 = vld [vmem:[#allocation2 + $0x60] sm:$0xff]  ;;  %v403_v42 = vld [vmem:[#allocation2 + $0x68] sm:$0xff]  ;;  %p989_p11 = scmp.ne.s32.totalorder %s1401_s14, 1 }
  0x64   : > { %v399_v41 = vld [vmem:[#allocation2] sm:$0xff]  ;;  %v411_v52 = vld [vmem:[#allocation2 + $0x70] sm:$0xff]  ;;  %v400_v53 = vld [vmem:[#allocation2 + $0x58] sm:$0xff] }
  0x65   : > { %v407_v51 = vld [vmem:[#allocation2 + $0x20] sm:$0xff]  ;;  %v404_v54 = vld [vmem:[#allocation2 + $0x8] sm:$0xff]  ;;  %v408_v63 = vld [vmem:[#allocation2 + $0x10] sm:$0xff] }
  0x66   : > { %544 = vmatpush.bf16.msra.mxu0 %v1037_v19  ;;  %1101 = vmatpush.bf16.msra.mxu1 %v1037_v19  ;;  %v412_v0 = vld [vmem:[#allocation2 + $0x78] sm:$0xff]  ;;  %v405_v2 = vld [vmem:[#allocation2 + $0x48] sm:$0xff] }
  0x67   : > { %1102 = vmatpush.bf16.msra.mxu2 %v1037_v19  ;;  %1103 = vmatpush.bf16.msra.mxu3 %v1037_v19  ;;  %v401_v1 = vld [vmem:[#allocation2 + $0x18] sm:$0xff]  ;;  %v413_v12 = vld [vmem:[#allocation2 + $0x28] sm:$0xff] }
  0x68   : > { %v409_v11 = vld [vmem:[#allocation2 + $0x38] sm:$0xff] }
  0x6a   : > { %545 = vmatpush.bf16.msra.mxu0 %v1036_v20  ;;  %1104 = vmatpush.bf16.msra.mxu1 %v1036_v20 }
  0x6b   : > { %1105 = vmatpush.bf16.msra.mxu2 %v1036_v20  ;;  %1106 = vmatpush.bf16.msra.mxu3 %v1036_v20 }
  0x6e   : > { %546 = vmatpush.bf16.msra.mxu0 %v1035_v21  ;;  %1107 = vmatpush.bf16.msra.mxu1 %v1035_v21 }
  0x6f   : > { %1108 = vmatpush.bf16.msra.mxu2 %v1035_v21  ;;  %1109 = vmatpush.bf16.msra.mxu3 %v1035_v21 }
  0x72   : > { %547 = vmatpush.bf16.msra.mxu0 %v1034_v22  ;;  %1110 = vmatpush.bf16.msra.mxu1 %v1034_v22 }
  0x73   : > { %1111 = vmatpush.bf16.msra.mxu2 %v1034_v22  ;;  %1112 = vmatpush.bf16.msra.mxu3 %v1034_v22 }
  0x76   : > { %548 = vmatpush.bf16.msra.mxu0 %v1033_v23  ;;  %1113 = vmatpush.bf16.msra.mxu1 %v1033_v23 }
  0x77   : > { %1114 = vmatpush.bf16.msra.mxu2 %v1033_v23  ;;  %1115 = vmatpush.bf16.msra.mxu3 %v1033_v23 }
  0x7a   : > { %549 = vmatpush.bf16.msra.mxu0 %v1032_v24  ;;  %1116 = vmatpush.bf16.msra.mxu1 %v1032_v24 }
  0x7b   : > { %1117 = vmatpush.bf16.msra.mxu2 %v1032_v24  ;;  %1118 = vmatpush.bf16.msra.mxu3 %v1032_v24 }
  0x7d   : > { %550 = vmatmul.bf16.vlgmr.msra.gmra.mxu0 %v1024_v25  ;;  %560 = vmatmul.bf16.vlgmr.msra.gmra.mxu1 %v1026_v26 }
  0x7e   : > { %570 = vmatmul.bf16.vlgmr.msra.gmra.mxu2 %v1028_v27  ;;  %580 = vmatmul.bf16.vlgmr.msra.gmra.mxu3 %v1030_v28 }
  0x8d   : > { %555 = vmatmul.bf16.gmra.mxu0 %v1025_v29  ;;  %565 = vmatmul.bf16.gmra.mxu1 %v1027_v30 }
  0x8e   : > { %575 = vmatmul.bf16.gmra.mxu2 %v1029_v31  ;;  %585 = vmatmul.bf16.gmra.mxu3 %v1031_v32 }
  0xfa   : > { %v551_v35 = vpop.f32.mrf.mxu0  ;;  %v561_v36 = vpop.f32.mrf.mxu1 }
  0xfb   : > { %v591_v37 = vadd.f32 %v551_v35, %v398_v33  ;;  %v595_v38 = vadd.f32 %v561_v36, %v402_v34 }
  0xfd   : > { %607 = vst [vmem:[#allocation2 + $0x30] sm:$0xff] %v591_v37 }
  0xfe   : > { %611 = vst [vmem:[#allocation2 + $0x50] sm:$0xff] %v595_v38 }
 0x101   : > { %v571_v43 = vpop.f32.mrf.mxu2  ;;  %v581_v44 = vpop.f32.mrf.mxu3 }
 0x102   : > { %v599_v45 = vadd.f32 %v571_v43, %v406_v39  ;;  %v603_v46 = vadd.f32 %v581_v44, %v410_v40  ;;  %v553_v47 = vpop.f32.mrf.mxu0  ;;  %v563_v48 = vpop.f32.mrf.mxu1 }
 0x103   : > { %v592_v49 = vadd.f32 %v553_v47, %v399_v41  ;;  %v596_v50 = vadd.f32 %v563_v48, %v403_v42 }
 0x104   : > { %615 = vst [vmem:[#allocation2 + $0x40] sm:$0xff] %v599_v45 }
 0x105   : > { %619 = vst [vmem:[#allocation2 + $0x60] sm:$0xff] %v603_v46 }
 0x106   : > { %608 = vst [vmem:[#allocation2] sm:$0xff] %v592_v49 }
 0x107   : > { %612 = vst [vmem:[#allocation2 + $0x68] sm:$0xff] %v596_v50 }
 0x109   : > { %v573_v55 = vpop.f32.mrf.mxu2  ;;  %v583_v56 = vpop.f32.mrf.mxu3 }
 0x10a   : > { %v600_v57 = vadd.f32 %v573_v55, %v407_v51  ;;  %v604_v58 = vadd.f32 %v583_v56, %v411_v52  ;;  %v556_v59 = vpop.f32.mrf.mxu0  ;;  %v566_v60 = vpop.f32.mrf.mxu1 }
 0x10b   : > { %v593_v61 = vadd.f32 %v556_v59, %v400_v53  ;;  %v597_v62 = vadd.f32 %v566_v60, %v404_v54 }
 0x10c   : > { %616 = vst [vmem:[#allocation2 + $0x20] sm:$0xff] %v600_v57 }
 0x10d   : > { %620 = vst [vmem:[#allocation2 + $0x70] sm:$0xff] %v604_v58 }
 0x10e   : > { %609 = vst [vmem:[#allocation2 + $0x58] sm:$0xff] %v593_v61 }
 0x10f   : > { %613 = vst [vmem:[#allocation2 + $0x8] sm:$0xff] %v597_v62 }
 0x111   : > { %v576_v3 = vpop.f32.mrf.mxu2  ;;  %v586_v4 = vpop.f32.mrf.mxu3 }
 0x112   : > { %v601_v5 = vadd.f32 %v576_v3, %v408_v63  ;;  %v605_v6 = vadd.f32 %v586_v4, %v412_v0  ;;  %v558_v7 = vpop.f32.mrf.mxu0  ;;  %v568_v8 = vpop.f32.mrf.mxu1 }
 0x113   : > { %v594_v9 = vadd.f32 %v558_v7, %v401_v1  ;;  %v598_v10 = vadd.f32 %v568_v8, %v405_v2 }
 0x114   : > { %617 = vst [vmem:[#allocation2 + $0x10] sm:$0xff] %v601_v5 }
 0x115   : > { %621 = vst [vmem:[#allocation2 + $0x78] sm:$0xff] %v605_v6 }
 0x116   : > { %610 = vst [vmem:[#allocation2 + $0x18] sm:$0xff] %v594_v9 }
 0x117   : > { %614 = vst [vmem:[#allocation2 + $0x48] sm:$0xff] %v598_v10 }
 0x119   : > { %v578_v13 = vpop.f32.mrf.mxu2  ;;  %v588_v14 = vpop.f32.mrf.mxu3  ;;  %627 = sbr.rel (%p989_p11) target bundleno = 479 (0x1df), region = 85 }
 0x11a   : > { %v602_v15 = vadd.f32 %v578_v13, %v409_v11  ;;  %v606_v16 = vadd.f32 %v588_v14, %v413_v12 }
 0x11c   : > { %618 = vst [vmem:[#allocation2 + $0x38] sm:$0xff] %v602_v15 }
 0x11d   : > { %622 = vst [vmem:[#allocation2 + $0x28] sm:$0xff] %v606_v16 }
 0x11e   : > { %v1047_v17 = vld [vmem:[%s1470_s6 + $0x38] sm:$0xff]  ;;  %v1046_v18 = vld [vmem:[%s1470_s6 + $0x30] sm:$0xff]  ;;  %v1045_v19 = vld [vmem:[%s1470_s6 + $0x28] sm:$0xff] }
 0x11f   : > { %750 = vmatpush.bf16.msra.mxu0 %v1047_v17  ;;  %1119 = vmatpush.bf16.msra.mxu1 %v1047_v17  ;;  %v1044_v20 = vld [vmem:[%s1470_s6 + $0x20] sm:$0xff]  ;;  %v1043_v22 = vld [vmem:[%s1470_s6 + $0x18] sm:$0xff]  ;;  %v1042_v24 = vld [vmem:[%s1470_s6 + $0x10] sm:$0xff] }
 0x120   : > { %1120 = vmatpush.bf16.msra.mxu2 %v1047_v17  ;;  %1121 = vmatpush.bf16.msra.mxu3 %v1047_v17  ;;  %v644_v21 = vld [vmem:[%s1471_s7] sm:$0xff]  ;;  %v628_v25 = vld [vmem:[#allocation2 + $0x30] sm:$0xff]  ;;  %v633_v28 = vld [vmem:[#allocation2 + $0x68] sm:$0xff] }
 0x121   : > { %v1422_v23 = vperm.slane %v644_v21, 0  ;;  %v629_v26 = vld [vmem:[#allocation2] sm:$0xff]  ;;  %v632_v27 = vld [vmem:[#allocation2 + $0x50] sm:$0xff]  ;;  %v1041_v38 = vld [vmem:[%s1470_s6 + $0x8] sm:$0xff] }
 0x122   : > { %v636_v29 = vld [vmem:[#allocation2 + $0x40] sm:$0xff]  ;;  %v641_v32 = vld [vmem:[#allocation2 + $0x70] sm:$0xff]  ;;  %v630_v55 = vld [vmem:[#allocation2 + $0x58] sm:$0xff] }
 0x123   : > { %751 = vmatpush.bf16.msra.mxu0 %v1046_v18  ;;  %1122 = vmatpush.bf16.msra.mxu1 %v1046_v18  ;;  %v637_v30 = vld [vmem:[#allocation2 + $0x20] sm:$0xff]  ;;  %v646_v33 = vadd.f32 %v1422_v23, %v628_v25  ;;  %v647_v34 = vadd.f32 %v1422_v23, %v629_v26  ;;  %v650_v35 = vadd.f32 %v1422_v23, %v632_v27  ;;  %v631_v56 = vld [vmem:[#allocation2 + $0x18] sm:$0xff]  ;;  %v634_v57 = vld [vmem:[#allocation2 + $0x8] sm:$0xff] }
 0x124   : > { %1123 = vmatpush.bf16.msra.mxu2 %v1046_v18  ;;  %1124 = vmatpush.bf16.msra.mxu3 %v1046_v18  ;;  %v640_v31 = vld [vmem:[#allocation2 + $0x60] sm:$0xff]  ;;  %v651_v36 = vadd.f32 %v1422_v23, %v633_v28  ;;  %v654_v37 = vadd.f32 %v1422_v23, %v636_v29  ;;  %v655_v39 = vadd.f32 %v1422_v23, %v637_v30  ;;  %v635_v58 = vld [vmem:[#allocation2 + $0x48] sm:$0xff]  ;;  %v638_v59 = vld [vmem:[#allocation2 + $0x10] sm:$0xff] }
 0x125   : > { %v658_v40 = vadd.f32 %v1422_v23, %v640_v31  ;;  %v659_v41 = vadd.f32 %v1422_v23, %v641_v32  ;;  %v662_v42 = vmax.f32 %v646_v33, 0.0  ;;  %v663_v43 = vmax.f32 %v647_v34, 0.0  ;;  %v1040_v46 = vld [vmem:[%s1470_s6] sm:$0xff]  ;;  %v639_v60 = vld [vmem:[#allocation2 + $0x38] sm:$0xff]  ;;  %v643_v62 = vld [vmem:[#allocation2 + $0x28] sm:$0xff] }
 0x126   : > { %v666_v44 = vmax.f32 %v650_v35, 0.0  ;;  %v667_v45 = vmax.f32 %v651_v36, 0.0  ;;  %v670_v47 = vmax.f32 %v654_v37, 0.0  ;;  %v671_v48 = vmax.f32 %v655_v39, 0.0  ;;  %v642_v61 = vld [vmem:[#allocation2 + $0x78] sm:$0xff] }
 0x127   : > { %752 = vmatpush.bf16.msra.mxu0 %v1045_v19  ;;  %1125 = vmatpush.bf16.msra.mxu1 %v1045_v19  ;;  %v674_v49 = vmax.f32 %v658_v40, 0.0  ;;  %v675_v50 = vmax.f32 %v659_v41, 0.0  ;;  %v678_v51 = vpack.c.bf16 %v663_v43, %v662_v42  ;;  %v648_v63 = vadd.f32 %v1422_v23, %v630_v55 }
 0x128   : > { %1126 = vmatpush.bf16.msra.mxu2 %v1045_v19  ;;  %1127 = vmatpush.bf16.msra.mxu3 %v1045_v19  ;;  %v680_v52 = vpack.c.bf16 %v667_v45, %v666_v44  ;;  %v682_v53 = vpack.c.bf16 %v671_v48, %v670_v47  ;;  %v649_v0 = vadd.f32 %v1422_v23, %v631_v56 }
 0x129   : > { %v684_v54 = vpack.c.bf16 %v675_v50, %v674_v49  ;;  %v652_v1 = vadd.f32 %v1422_v23, %v634_v57  ;;  %v653_v2 = vadd.f32 %v1422_v23, %v635_v58  ;;  %v656_v3 = vadd.f32 %v1422_v23, %v638_v59 }
 0x12a   : > { %v657_v4 = vadd.f32 %v1422_v23, %v639_v60  ;;  %v660_v5 = vadd.f32 %v1422_v23, %v642_v61  ;;  %v661_v6 = vadd.f32 %v1422_v23, %v643_v62  ;;  %v664_v7 = vmax.f32 %v648_v63, 0.0 }
 0x12b   : > { %753 = vmatpush.bf16.msra.mxu0 %v1044_v20  ;;  %1128 = vmatpush.bf16.msra.mxu1 %v1044_v20  ;;  %v665_v8 = vmax.f32 %v649_v0, 0.0  ;;  %v668_v9 = vmax.f32 %v652_v1, 0.0  ;;  %v669_v10 = vmax.f32 %v653_v2, 0.0  ;;  %v672_v11 = vmax.f32 %v656_v3, 0.0 }
 0x12c   : > { %1129 = vmatpush.bf16.msra.mxu2 %v1044_v20  ;;  %1130 = vmatpush.bf16.msra.mxu3 %v1044_v20  ;;  %v673_v12 = vmax.f32 %v657_v4, 0.0  ;;  %v676_v13 = vmax.f32 %v660_v5, 0.0  ;;  %v677_v14 = vmax.f32 %v661_v6, 0.0 }
 0x12d   : > { %v679_v15 = vpack.c.bf16 %v665_v8, %v664_v7  ;;  %v681_v16 = vpack.c.bf16 %v669_v10, %v668_v9 }
 0x12e   : > { %v683_v17 = vpack.c.bf16 %v673_v12, %v672_v11  ;;  %v685_v18 = vpack.c.bf16 %v677_v14, %v676_v13 }
 0x12f   : > { %754 = vmatpush.bf16.msra.mxu0 %v1043_v22  ;;  %1131 = vmatpush.bf16.msra.mxu1 %v1043_v22 }
 0x130   : > { %1132 = vmatpush.bf16.msra.mxu2 %v1043_v22  ;;  %1133 = vmatpush.bf16.msra.mxu3 %v1043_v22 }
 0x133   : > { %755 = vmatpush.bf16.msra.mxu0 %v1042_v24  ;;  %1134 = vmatpush.bf16.msra.mxu1 %v1042_v24 }
 0x134   : > { %1135 = vmatpush.bf16.msra.mxu2 %v1042_v24  ;;  %1136 = vmatpush.bf16.msra.mxu3 %v1042_v24 }
 0x137   : > { %756 = vmatpush.bf16.msra.mxu0 %v1041_v38  ;;  %1137 = vmatpush.bf16.msra.mxu1 %v1041_v38 }
 0x138   : > { %1138 = vmatpush.bf16.msra.mxu2 %v1041_v38  ;;  %1139 = vmatpush.bf16.msra.mxu3 %v1041_v38 }
 0x13b   : > { %757 = vmatpush.bf16.msra.mxu0 %v1040_v46  ;;  %1140 = vmatpush.bf16.msra.mxu1 %v1040_v46 }
 0x13c   : > { %1141 = vmatpush.bf16.msra.mxu2 %v1040_v46  ;;  %1142 = vmatpush.bf16.msra.mxu3 %v1040_v46 }
 0x13e   : > { %758 = vmatmul.bf16.vlgmr.msra.gmra.mxu0 %v678_v51  ;;  %768 = vmatmul.bf16.vlgmr.msra.gmra.mxu1 %v680_v52 }
 0x13f   : > { %778 = vmatmul.bf16.vlgmr.msra.gmra.mxu2 %v682_v53  ;;  %788 = vmatmul.bf16.vlgmr.msra.gmra.mxu3 %v684_v54 }
 0x14e   : > { %763 = vmatmul.bf16.gmra.mxu0 %v679_v15  ;;  %773 = vmatmul.bf16.gmra.mxu1 %v681_v16 }
 0x14f   : > { %783 = vmatmul.bf16.gmra.mxu2 %v683_v17  ;;  %793 = vmatmul.bf16.gmra.mxu3 %v685_v18 }
 0x1bb   : > { %v759_v19 = vpop.f32.mrf.mxu0  ;;  %v769_v20 = vpop.f32.mrf.mxu1 }
 0x1c2   : > { %v779_v21 = vpop.f32.mrf.mxu2  ;;  %v789_v22 = vpop.f32.mrf.mxu3 }
 0x1c3   : > { %v761_v23 = vpop.f32.mrf.mxu0  ;;  %v771_v24 = vpop.f32.mrf.mxu1 }
 0x1c4   : > { %v1051_v25 = vpack.c.bf16 %v761_v23, %v759_v19  ;;  %v1061_v26 = vpack.c.bf16 %v771_v24, %v769_v20 }
 0x1c6   : > { %1052 = vst [vmem:[%s1380_s1] sm:$0xff] %v1051_v25  }
 0x1c7   : > { %1089 = vst [vmem:[%s1380_s1 + $0x10] sm:$0xff] %v1061_v26  }
 0x1ca   : > { %v781_v27 = vpop.f32.mrf.mxu2  ;;  %v791_v28 = vpop.f32.mrf.mxu3 }
 0x1cb   : > { %v1071_v29 = vpack.c.bf16 %v781_v27, %v779_v21  ;;  %v1081_v30 = vpack.c.bf16 %v791_v28, %v789_v22  ;;  %v764_v31 = vpop.f32.mrf.mxu0  ;;  %v774_v32 = vpop.f32.mrf.mxu1 }
 0x1cd   : > { %1091 = vst [vmem:[%s1380_s1 + $0x20] sm:$0xff] %v1071_v29  }
 0x1ce   : > { %1093 = vst [vmem:[%s1380_s1 + $0x30] sm:$0xff] %v1081_v30  }
 0x1d2   : > { %v784_v33 = vpop.f32.mrf.mxu2  ;;  %v794_v34 = vpop.f32.mrf.mxu3 }
 0x1d3   : > { %v766_v35 = vpop.f32.mrf.mxu0  ;;  %v776_v36 = vpop.f32.mrf.mxu1 }
 0x1d4   : > { %v1056_v37 = vpack.c.bf16 %v766_v35, %v764_v31  ;;  %v1066_v38 = vpack.c.bf16 %v776_v36, %v774_v32 }
 0x1d6   : > { %1088 = vst [vmem:[%s1380_s1 + $0x8] sm:$0xff] %v1056_v37  }
 0x1d7   : > { %1090 = vst [vmem:[%s1380_s1 + $0x18] sm:$0xff] %v1066_v38  }
 0x1da   : > { %v786_v39 = vpop.f32.mrf.mxu2  ;;  %v796_v40 = vpop.f32.mrf.mxu3 }
 0x1db   : > { %v1076_v41 = vpack.c.bf16 %v786_v39, %v784_v33  ;;  %v1086_v42 = vpack.c.bf16 %v796_v40, %v794_v34 }
 0x1dd   : > { %1092 = vst [vmem:[%s1380_s1 + $0x28] sm:$0xff] %v1076_v41  }
 0x1de   : > { %1094 = vst [vmem:[%s1380_s1 + $0x38] sm:$0xff] %v1086_v42  }
 0x1df PF: > { %p38_p12 = scmp.ge.s32.totalorder %s1328_s3, 7   ;;  %s1476_s1 = smov %s1241_s20 }
 0x1e0   : > { %s1477_s20 = smov %s1339_s30  ;;  %s1478_s21 = smov %s1328_s3 }
 0x1e1   :  { %40 = sbr.rel (!%p38_p12) target bundleno = 13 (0xd), region = 123 }

// kernel: _impl.5
= control target key start
LH: loop header
LB: loop body
LE: loop exit
PB: predicated region body
PF: predicated region fallthrough
CT: control target
= control target key end

     0   :  { %s1018_s15 = smov [#allocation4]   ;;  %s1019_s16 = smov [#allocation5]   ;;  %s1215_s0 = inlined_call_operand.vmem [shape: s32[5], index: 0, kind: input, shape index: {}]   ;;  %s1216_s4 = inlined_call_operand.vmem [shape: bf16[384,384], index: 4, kind: input, shape index: {}]   ;;  %s1217_s5 = inlined_call_operand.vmem [shape: bf16[384,128], index: 5, kind: input, shape index: {}]   ;;  %s1218_s6 = inlined_call_operand.vmem [shape: bf16[8,384], index: 6, kind: input, shape index: {}]   ;;  %s1219_s7 = inlined_call_operand.vmem [shape: f32[8,128], index: 7, kind: input, shape index: {}]   ;;  %s1220_s8 = inlined_call_operand.vmem [shape: f32[8,128], index: 8, kind: input, shape index: {}]   ;;  %s1221_s9 = inlined_call_operand.vmem [shape: f32[8,128], index: 9, kind: output, shape index: {}]   ;;  %s1222_s1 = inlined_call_operand.vmem [shape: s32[5], index: 1, kind: input, shape index: {}]   ;;  %s1223_s2 = inlined_call_operand.vmem [shape: s32[5], index: 2, kind: input, shape index: {}]   ;;  %s1224_s3 = inlined_call_operand.vmem [shape: s32[5], index: 3, kind: input, shape index: {}]  }
   0x1   :  { %s15_s11 = sshll.u32 %s1215_s0, 4  ;;  %s20_s14 = sshll.u32 %s1222_s1, 4  ;;  %s16_s11 = int_to_ptr.vmem [resolvable:$true] %s15_s11  ;;  %s21_s14 = int_to_ptr.vmem [resolvable:$true] %s20_s14 }
   0x2   :  { %18 = dma.vmem_to_smem %s16_s11, 16, %s1018_s15, [#allocation3] }
   0x3   :  { %23 = dma.vmem_to_smem %s21_s14, 16, %s1019_s16, [#allocation3] }
   0x4   :  { %s25_s19 = sshll.u32 %s1223_s2, 4  ;;  %s30_s22 = sshll.u32 %s1224_s3, 4  ;;  %s26_s19 = int_to_ptr.vmem [resolvable:$true] %s25_s19  ;;  %s31_s22 = int_to_ptr.vmem [resolvable:$true] %s30_s22 }
   0x5   :  { %s1020_s0 = smov [#allocation6]   ;;  %s1021_s23 = smov [#allocation7]  }
   0x6   :  { %28 = dma.vmem_to_smem %s26_s19, 16, %s1020_s0, [#allocation3] }
   0x7   :  { %33 = dma.vmem_to_smem %s31_s22, 16, %s1021_s23, [#allocation3] }
   0x8   :  { %1004 = dma.done.wait [#allocation3], 64 }
   0x9   :  { %1005 = vsyncadd [#allocation3], 4294967232 }
   0xa   :  { %36 = sfence }
   0xb   :  { %s1086_s1 = smov 0   ;;  %s1088_s24 = smov 0  }
   0xc   :  { %s1090_s25 = smov 0  }
   0xd LB: > { %s1102_s2 = sadd.s32 4294967295, %s1016_s25   ;;  %s1105_s3 = sadd.s32 1, %s1016_s25   ;;  %s1016_s25 = sphi %s1090_s25, %s1227_s25   ;;  %s1012_s24 = sphi %s1088_s24, %s1226_s24   ;;  %s1008_s1 = sphi %s1086_s1, %s1225_s1  }
   0xe   : > { %s46_s26 = sld [smem:[#allocation4 + %s1016_s25]]  ;;  %p62_p0 = scmp.ne.s32.totalorder %s1012_s24, %s1008_s1 }
   0xf   : > { %s47_s27 = sld [smem:[#allocation5 + %s1016_s25]]  ;;  %p63_p1 = scmp.eq.s32.totalorder %s1016_s25, 0 }
  0x10   : > { %s48_s28 = sld [smem:[#allocation4 + %s1105_s3]]  ;;  %s55_s12 = sadd.s32 1, %s1012_s24 }
  0x11   : > { %s49_s29 = sld [smem:[#allocation5 + %s1105_s3]]  ;;  %p64_p2 = por %p63_p1, %p62_p0 }
  0x12   : > { %p793_p4 = scmp.ge.s32.totalorder %s1016_s25, 5 }
  0x16   : > { %s50_s30 = ssub.s32 %s46_s26, %s48_s28 }
  0x17   : > { %s51_s10 = ssub.s32 %s47_s27, %s49_s29  ;;  %213 = sbr.rel (%p793_p4) target bundleno = 56 (0x38), region = 24 }
  0x18   : > { %s52_s11 = sor.u32 %s51_s10, %s50_s30 }
  0x19   : > { %p53_p3 = scmp.eq.s32.totalorder %s52_s11, 0 }
  0x1b   : > { %s1116_s13 = scalar_select %p53_p3, %s1012_s24, %s55_s12  }
  0x1c   : > { %216 = sbr.rel (!%p64_p2) target bundleno = 56 (0x38), region = 28  ;;  %s221_s14 = sld [smem:[#allocation4 + %s1016_s25]] (%p64_p2) }
  0x1d   : > { %s222_s15 = sld [smem:[#allocation5 + %s1016_s25]] (%p64_p2)  ;;  %s218_s16 = sand.u32 (%p64_p2), 1, %s1012_s24  }
  0x1e   : > { %s794_s17 = sshll.u32 (%p64_p2), %s218_s16, 6 }
  0x1f   : > { %s220_s23 = scalar_lea.vmem (%p64_p2), [#allocation8], %s794_s17 }
  0x22   : > { %s913_s18 = smul.u32 48, %s221_s14 }
  0x24   : > { %s225_s19 = sadd.s32 %s913_s18, %s222_s15 }
  0x25   : > { %s797_s20 = sshll.u32 %s225_s19, 2 }
  0x26   : > { %s1125_s0 = scalar_lea.vmem %s1216_s4, %s797_s20 }
  0x27   : > { %v244_v0 = vld [vmem:[%s1125_s0] sm:$0xf]  ;;  %v246_v1 = vld [vmem:[%s1125_s0 + $0xc] sm:$0xf]  ;;  %v248_v2 = vld [vmem:[%s1125_s0 + $0x18] sm:$0xf] }
  0x28   : > { %245 = vst [vmem:[%s220_s23] sm:$0xf] %v244_v0  ;;  %v250_v3 = vld [vmem:[%s1125_s0 + $0x24] sm:$0xf]  ;;  %v252_v4 = vld [vmem:[%s1125_s0 + $0x30] sm:$0xf] }
  0x29   : > { %247 = vst [vmem:[%s220_s23 + $0x4] sm:$0xf] %v246_v1  ;;  %v254_v5 = vld [vmem:[%s1125_s0 + $0x3c] sm:$0xf]  ;;  %v256_v6 = vld [vmem:[%s1125_s0 + $0x48] sm:$0xf] }
  0x2a   : > { %249 = vst [vmem:[%s220_s23 + $0x8] sm:$0xf] %v248_v2  ;;  %v258_v7 = vld [vmem:[%s1125_s0 + $0x54] sm:$0xf]  ;;  %v260_v8 = vld [vmem:[%s1125_s0 + $0x60] sm:$0xf] }
  0x2b   : > { %251 = vst [vmem:[%s220_s23 + $0xc] sm:$0xf] %v250_v3  ;;  %v262_v9 = vld [vmem:[%s1125_s0 + $0x6c] sm:$0xf]  ;;  %v264_v10 = vld [vmem:[%s1125_s0 + $0x78] sm:$0xf] }
  0x2c   : > { %253 = vst [vmem:[%s220_s23 + $0x10] sm:$0xf] %v252_v4  ;;  %v266_v11 = vld [vmem:[%s1125_s0 + $0x84] sm:$0xf]  ;;  %v268_v12 = vld [vmem:[%s1125_s0 + $0x90] sm:$0xf] }
  0x2d   : > { %255 = vst [vmem:[%s220_s23 + $0x14] sm:$0xf] %v254_v5  ;;  %v270_v13 = vld [vmem:[%s1125_s0 + $0x9c] sm:$0xf]  ;;  %v272_v14 = vld [vmem:[%s1125_s0 + $0xa8] sm:$0xf] }
  0x2e   : > { %257 = vst [vmem:[%s220_s23 + $0x18] sm:$0xf] %v256_v6  ;;  %v274_v15 = vld [vmem:[%s1125_s0 + $0xb4] sm:$0xf] }
  0x2f   : > { %259 = vst [vmem:[%s220_s23 + $0x1c] sm:$0xf] %v258_v7 }
  0x30   : > { %261 = vst [vmem:[%s220_s23 + $0x20] sm:$0xf] %v260_v8 }
  0x31   : > { %263 = vst [vmem:[%s220_s23 + $0x24] sm:$0xf] %v262_v9 }
  0x32   : > { %265 = vst [vmem:[%s220_s23 + $0x28] sm:$0xf] %v264_v10 }
  0x33   : > { %267 = vst [vmem:[%s220_s23 + $0x2c] sm:$0xf] %v266_v11 }
  0x34   : > { %269 = vst [vmem:[%s220_s23 + $0x30] sm:$0xf] %v268_v12 }
  0x35   : > { %271 = vst [vmem:[%s220_s23 + $0x34] sm:$0xf] %v270_v13 }
  0x36   : > { %273 = vst [vmem:[%s220_s23 + $0x38] sm:$0xf] %v272_v14 }
  0x37   : > { %275 = vst [vmem:[%s220_s23 + $0x3c] sm:$0xf] %v274_v15 }
  0x38 PF: > { %p798_p5 = scmp.ge.s32.totalorder %s1016_s25, 1  ;;  %p350_p6 = scmp.lt.s32.totalorder %s1016_s25, 6 }
  0x3a   : > { %p351_p7 = pnand %p798_p5, %p350_p6 }
  0x3b   : > { %s357_s26 = sand.u32 (!%p351_p7), 1, %s1008_s1   ;;  %s393_s27 = sld [smem:[#allocation5 + %s1102_s2]] (!%p351_p7) }
  0x3c   : > { %354 = sbr.rel (%p351_p7) target bundleno = 487 (0x1e7), region = 77  ;;  %s799_s28 = sshll.u32 (!%p351_p7), %s357_s26, 6 }
  0x3d   : > { %s401_s29 = sld [smem:[#allocation4 + %s1102_s2]] (!%p351_p7)  ;;  %s1158_s1 = scalar_lea.vmem (!%p351_p7), [#allocation8], %s799_s28 }
  0x3e   : > { %p803_p10 = scmp.ne.s32.totalorder (!%p351_p7), %s1102_s2, 0 }
  0x41   : > { %s800_s30 = sshll.u32 %s393_s27, 4 }
  0x42   : > { %p395_p8 = scmp.lt.s32.totalorder %s800_s30, 47 }
  0x43   : > { %p402_p9 = scmp.lt.s32.totalorder %s401_s29, 2  ;;  %410 = sbr.rel (%p803_p10) target bundleno = 74 (0x4a), region = 85 }
  0x44   : > { %s1229_s30 = smov (!%p395_p8, %s800_s30), 47 }
  0x45   : > { %s1231_s29 = smov (!%p402_p9, %s401_s29), 2  ;;  %s801_s10 = sshll.u32 %s1229_s30, 2 }
  0x46   : > { %s1151_s14 = scalar_lea.vmem %s1217_s5, %s801_s10  ;;  %s802_s25 = sshll.u32 %s1231_s29, 2 }
  0x47   : > { %s1156_s17 = scalar_lea.vmem %s1218_s6, %s802_s25 }
  0x48   : > { %v1022_v16 = vmov 0.0  }
  0x49   : > { %411 = vst [vmem:[%s1221_s9] sm:$0xff] %v1022_v16 }
  0x4a PF: > { %s412_s20 = sld [smem:[#allocation6 + %s1102_s2]] }
  0x50   : > { %p804_p11 = scmp.ne.s32.totalorder %s412_s20, 1 }
  0x52   : > { %416 = sbr.rel (%p804_p11) target bundleno = 104 (0x68), region = 89 }
  0x57   : > { %v1023_v17 = vmov 0.0  }
  0x58   : > { %417 = vst [vmem:[#allocation2 + $0x30] sm:$0xff] %v1023_v17 }
  0x59   : > { %418 = vst [vmem:[#allocation2] sm:$0xff] %v1023_v17 }
  0x5a   : > { %419 = vst [vmem:[#allocation2 + $0x58] sm:$0xff] %v1023_v17 }
  0x5b   : > { %420 = vst [vmem:[#allocation2 + $0x18] sm:$0xff] %v1023_v17 }
  0x5c   : > { %421 = vst [vmem:[#allocation2 + $0x50] sm:$0xff] %v1023_v17 }
  0x5d   : > { %422 = vst [vmem:[#allocation2 + $0x68] sm:$0xff] %v1023_v17 }
  0x5e   : > { %423 = vst [vmem:[#allocation2 + $0x8] sm:$0xff] %v1023_v17 }
  0x5f   : > { %424 = vst [vmem:[#allocation2 + $0x48] sm:$0xff] %v1023_v17 }
  0x60   : > { %425 = vst [vmem:[#allocation2 + $0x40] sm:$0xff] %v1023_v17 }
  0x61   : > { %426 = vst [vmem:[#allocation2 + $0x20] sm:$0xff] %v1023_v17 }
  0x62   : > { %427 = vst [vmem:[#allocation2 + $0x10] sm:$0xff] %v1023_v17 }
  0x63   : > { %428 = vst [vmem:[#allocation2 + $0x38] sm:$0xff] %v1023_v17 }
  0x64   : > { %429 = vst [vmem:[#allocation2 + $0x60] sm:$0xff] %v1023_v17 }
  0x65   : > { %430 = vst [vmem:[#allocation2 + $0x70] sm:$0xff] %v1023_v17 }
  0x66   : > { %431 = vst [vmem:[#allocation2 + $0x78] sm:$0xff] %v1023_v17 }
  0x67   : > { %432 = vst [vmem:[#allocation2 + $0x28] sm:$0xff] %v1023_v17 }
  0x68 PF: > { %v888_v18 = vld [vmem:[%s1151_s14 + $0x38] sm:$0xff]  ;;  %v887_v19 = vld [vmem:[%s1151_s14 + $0x30] sm:$0xff]  ;;  %v886_v20 = vld [vmem:[%s1151_s14 + $0x28] sm:$0xff]  ;;  %s1182_s21 = sld [smem:[#allocation7 + %s1102_s2]] }
  0x69   : > { %577 = vmatpush.bf16.msra.mxu0 %v888_v18  ;;  %889 = vmatpush.bf16.msra.mxu1 %v888_v18  ;;  %v885_v21 = vld [vmem:[%s1151_s14 + $0x20] sm:$0xff]  ;;  %v884_v22 = vld [vmem:[%s1151_s14 + $0x18] sm:$0xff]  ;;  %v883_v23 = vld [vmem:[%s1151_s14 + $0x10] sm:$0xff] }
  0x6a   : > { %890 = vmatpush.bf16.msra.mxu2 %v888_v18  ;;  %891 = vmatpush.bf16.msra.mxu3 %v888_v18  ;;  %v882_v24 = vld [vmem:[%s1151_s14 + $0x8] sm:$0xff]  ;;  %v881_v25 = vld [vmem:[%s1151_s14] sm:$0xff]  ;;  %v875_v27 = vld [vmem:[%s1158_s1 + $0x10] sm:$0xff] }
  0x6b   : > { %v873_v26 = vld [vmem:[%s1158_s1] sm:$0xff]  ;;  %v879_v29 = vld [vmem:[%s1158_s1 + $0x30] sm:$0xff]  ;;  %v874_v30 = vld [vmem:[%s1158_s1 + $0x8] sm:$0xff] }
  0x6c   : > { %v877_v28 = vld [vmem:[%s1158_s1 + $0x20] sm:$0xff]  ;;  %v876_v31 = vld [vmem:[%s1158_s1 + $0x18] sm:$0xff]  ;;  %v878_v32 = vld [vmem:[%s1158_s1 + $0x28] sm:$0xff] }
  0x6d   : > { %578 = vmatpush.bf16.msra.mxu0 %v887_v19  ;;  %892 = vmatpush.bf16.msra.mxu1 %v887_v19  ;;  %v880_v33 = vld [vmem:[%s1158_s1 + $0x38] sm:$0xff]  ;;  %v433_v34 = vld [vmem:[#allocation2 + $0x30] sm:$0xff]  ;;  %v441_v40 = vld [vmem:[#allocation2 + $0x40] sm:$0xff] }
  0x6e   : > { %893 = vmatpush.bf16.msra.mxu2 %v887_v19  ;;  %894 = vmatpush.bf16.msra.mxu3 %v887_v19  ;;  %v437_v35 = vld [vmem:[#allocation2 + $0x50] sm:$0xff]  ;;  %v445_v41 = vld [vmem:[#allocation2 + $0x60] sm:$0xff]  ;;  %v438_v43 = vld [vmem:[#allocation2 + $0x68] sm:$0xff]  ;;  %p869_p12 = scmp.ne.s32.totalorder %s1182_s21, 1 }
  0x6f   : > { %v434_v42 = vld [vmem:[#allocation2] sm:$0xff]  ;;  %v446_v53 = vld [vmem:[#allocation2 + $0x70] sm:$0xff]  ;;  %v435_v54 = vld [vmem:[#allocation2 + $0x58] sm:$0xff] }
  0x70   : > { %v442_v52 = vld [vmem:[#allocation2 + $0x20] sm:$0xff]  ;;  %v439_v55 = vld [vmem:[#allocation2 + $0x8] sm:$0xff]  ;;  %v443_v0 = vld [vmem:[#allocation2 + $0x10] sm:$0xff] }
  0x71   : > { %579 = vmatpush.bf16.msra.mxu0 %v886_v20  ;;  %895 = vmatpush.bf16.msra.mxu1 %v886_v20  ;;  %v447_v1 = vld [vmem:[#allocation2 + $0x78] sm:$0xff]  ;;  %v440_v3 = vld [vmem:[#allocation2 + $0x48] sm:$0xff] }
  0x72   : > { %896 = vmatpush.bf16.msra.mxu2 %v886_v20  ;;  %897 = vmatpush.bf16.msra.mxu3 %v886_v20  ;;  %v436_v2 = vld [vmem:[#allocation2 + $0x18] sm:$0xff]  ;;  %v448_v13 = vld [vmem:[#allocation2 + $0x28] sm:$0xff] }
  0x73   : > { %v444_v12 = vld [vmem:[#allocation2 + $0x38] sm:$0xff] }
  0x75   : > { %580 = vmatpush.bf16.msra.mxu0 %v885_v21  ;;  %898 = vmatpush.bf16.msra.mxu1 %v885_v21 }
  0x76   : > { %899 = vmatpush.bf16.msra.mxu2 %v885_v21  ;;  %900 = vmatpush.bf16.msra.mxu3 %v885_v21 }
  0x79   : > { %581 = vmatpush.bf16.msra.mxu0 %v884_v22  ;;  %901 = vmatpush.bf16.msra.mxu1 %v884_v22 }
  0x7a   : > { %902 = vmatpush.bf16.msra.mxu2 %v884_v22  ;;  %903 = vmatpush.bf16.msra.mxu3 %v884_v22 }
  0x7d   : > { %582 = vmatpush.bf16.msra.mxu0 %v883_v23  ;;  %904 = vmatpush.bf16.msra.mxu1 %v883_v23 }
  0x7e   : > { %905 = vmatpush.bf16.msra.mxu2 %v883_v23  ;;  %906 = vmatpush.bf16.msra.mxu3 %v883_v23 }
  0x81   : > { %583 = vmatpush.bf16.msra.mxu0 %v882_v24  ;;  %907 = vmatpush.bf16.msra.mxu1 %v882_v24 }
  0x82   : > { %908 = vmatpush.bf16.msra.mxu2 %v882_v24  ;;  %909 = vmatpush.bf16.msra.mxu3 %v882_v24 }
  0x85   : > { %584 = vmatpush.bf16.msra.mxu0 %v881_v25  ;;  %910 = vmatpush.bf16.msra.mxu1 %v881_v25 }
  0x86   : > { %911 = vmatpush.bf16.msra.mxu2 %v881_v25  ;;  %912 = vmatpush.bf16.msra.mxu3 %v881_v25 }
  0x88   : > { %585 = vmatmul.bf16.vlgmr.msra.gmra.mxu0 %v873_v26  ;;  %595 = vmatmul.bf16.vlgmr.msra.gmra.mxu1 %v875_v27 }
  0x89   : > { %605 = vmatmul.bf16.vlgmr.msra.gmra.mxu2 %v877_v28  ;;  %615 = vmatmul.bf16.vlgmr.msra.gmra.mxu3 %v879_v29 }
  0x98   : > { %590 = vmatmul.bf16.gmra.mxu0 %v874_v30  ;;  %600 = vmatmul.bf16.gmra.mxu1 %v876_v31 }
  0x99   : > { %610 = vmatmul.bf16.gmra.mxu2 %v878_v32  ;;  %620 = vmatmul.bf16.gmra.mxu3 %v880_v33 }
 0x105   : > { %v586_v36 = vpop.f32.mrf.mxu0  ;;  %v596_v37 = vpop.f32.mrf.mxu1 }
 0x106   : > { %v626_v38 = vadd.f32 %v586_v36, %v433_v34  ;;  %v630_v39 = vadd.f32 %v596_v37, %v437_v35 }
 0x108   : > { %642 = vst [vmem:[#allocation2 + $0x30] sm:$0xff] %v626_v38 }
 0x109   : > { %646 = vst [vmem:[#allocation2 + $0x50] sm:$0xff] %v630_v39 }
 0x10c   : > { %v606_v44 = vpop.f32.mrf.mxu2  ;;  %v616_v45 = vpop.f32.mrf.mxu3 }
 0x10d   : > { %v634_v46 = vadd.f32 %v606_v44, %v441_v40  ;;  %v638_v47 = vadd.f32 %v616_v45, %v445_v41  ;;  %v588_v48 = vpop.f32.mrf.mxu0  ;;  %v598_v49 = vpop.f32.mrf.mxu1 }
 0x10e   : > { %v627_v50 = vadd.f32 %v588_v48, %v434_v42  ;;  %v631_v51 = vadd.f32 %v598_v49, %v438_v43 }
 0x10f   : > { %650 = vst [vmem:[#allocation2 + $0x40] sm:$0xff] %v634_v46 }
 0x110   : > { %654 = vst [vmem:[#allocation2 + $0x60] sm:$0xff] %v638_v47 }
 0x111   : > { %643 = vst [vmem:[#allocation2] sm:$0xff] %v627_v50 }
 0x112   : > { %647 = vst [vmem:[#allocation2 + $0x68] sm:$0xff] %v631_v51 }
 0x114   : > { %v608_v56 = vpop.f32.mrf.mxu2  ;;  %v618_v57 = vpop.f32.mrf.mxu3 }
 0x115   : > { %v635_v58 = vadd.f32 %v608_v56, %v442_v52  ;;  %v639_v59 = vadd.f32 %v618_v57, %v446_v53  ;;  %v591_v60 = vpop.f32.mrf.mxu0  ;;  %v601_v61 = vpop.f32.mrf.mxu1 }
 0x116   : > { %v628_v62 = vadd.f32 %v591_v60, %v435_v54  ;;  %v632_v63 = vadd.f32 %v601_v61, %v439_v55 }
 0x117   : > { %651 = vst [vmem:[#allocation2 + $0x20] sm:$0xff] %v635_v58 }
 0x118   : > { %655 = vst [vmem:[#allocation2 + $0x70] sm:$0xff] %v639_v59 }
 0x119   : > { %644 = vst [vmem:[#allocation2 + $0x58] sm:$0xff] %v628_v62 }
 0x11a   : > { %648 = vst [vmem:[#allocation2 + $0x8] sm:$0xff] %v632_v63 }
 0x11c   : > { %v611_v4 = vpop.f32.mrf.mxu2  ;;  %v621_v5 = vpop.f32.mrf.mxu3 }
 0x11d   : > { %v636_v6 = vadd.f32 %v611_v4, %v443_v0  ;;  %v640_v7 = vadd.f32 %v621_v5, %v447_v1  ;;  %v593_v8 = vpop.f32.mrf.mxu0  ;;  %v603_v9 = vpop.f32.mrf.mxu1 }
 0x11e   : > { %v629_v10 = vadd.f32 %v593_v8, %v436_v2  ;;  %v633_v11 = vadd.f32 %v603_v9, %v440_v3 }
 0x11f   : > { %652 = vst [vmem:[#allocation2 + $0x10] sm:$0xff] %v636_v6 }
 0x120   : > { %656 = vst [vmem:[#allocation2 + $0x78] sm:$0xff] %v640_v7 }
 0x121   : > { %645 = vst [vmem:[#allocation2 + $0x18] sm:$0xff] %v629_v10 }
 0x122   : > { %649 = vst [vmem:[#allocation2 + $0x48] sm:$0xff] %v633_v11 }
 0x124   : > { %v613_v14 = vpop.f32.mrf.mxu2  ;;  %v623_v15 = vpop.f32.mrf.mxu3  ;;  %662 = sbr.rel (%p869_p12) target bundleno = 473 (0x1d9), region = 93 }
 0x125   : > { %v637_v16 = vadd.f32 %v613_v14, %v444_v12  ;;  %v641_v17 = vadd.f32 %v623_v15, %v448_v13 }
 0x127   : > { %653 = vst [vmem:[#allocation2 + $0x38] sm:$0xff] %v637_v16 }
 0x128   : > { %657 = vst [vmem:[#allocation2 + $0x28] sm:$0xff] %v641_v17 }
 0x129   : > { %v677_v18 = vld [vmem:[#allocation2 + $0x78] sm:$0xff]  ;;  %v679_v20 = vld [vmem:[%s1219_s7] sm:$0xff]  ;;  %v676_v23 = vld [vmem:[#allocation2 + $0x70] sm:$0xff] }
 0x12a   : > { %v680_v21 = vperm.slane %v679_v20, 0  ;;  %v675_v22 = vld [vmem:[#allocation2 + $0x60] sm:$0xff]  ;;  %v673_v28 = vld [vmem:[#allocation2 + $0x10] sm:$0xff]  ;;  %v669_v39 = vld [vmem:[#allocation2 + $0x8] sm:$0xff] }
 0x12b   : > { %v671_v34 = vld [vmem:[#allocation2 + $0x40] sm:$0xff]  ;;  %v670_v40 = vld [vmem:[#allocation2 + $0x48] sm:$0xff]  ;;  %v667_v44 = vld [vmem:[#allocation2 + $0x50] sm:$0xff] }
 0x12c   : > { %v695_v24 = vadd.f32 %v680_v21, %v677_v18  ;;  %v693_v26 = vadd.f32 %v680_v21, %v675_v22  ;;  %v694_v27 = vadd.f32 %v680_v21, %v676_v23  ;;  %v691_v32 = vadd.f32 %v680_v21, %v673_v28  ;;  %v672_v35 = vld [vmem:[#allocation2 + $0x20] sm:$0xff]  ;;  %v668_v45 = vld [vmem:[#allocation2 + $0x68] sm:$0xff]  ;;  %v665_v49 = vld [vmem:[#allocation2 + $0x58] sm:$0xff] }
 0x12d   : > { %v689_v37 = vadd.f32 %v680_v21, %v671_v34  ;;  %v690_v38 = vadd.f32 %v680_v21, %v672_v35  ;;  %v687_v42 = vadd.f32 %v680_v21, %v669_v39  ;;  %v688_v43 = vadd.f32 %v680_v21, %v670_v40  ;;  %v666_v50 = vld [vmem:[#allocation2 + $0x18] sm:$0xff]  ;;  %v663_v54 = vld [vmem:[#allocation2 + $0x30] sm:$0xff]  ;;  %v664_v55 = vld [vmem:[#allocation2] sm:$0xff] }
 0x12e   : > { %v674_v29 = vld [vmem:[#allocation2 + $0x38] sm:$0xff]  ;;  %v705_v31 = vpack.c.bf16 %v694_v27, %v693_v26  ;;  %v685_v47 = vadd.f32 %v680_v21, %v667_v44  ;;  %v686_v48 = vadd.f32 %v680_v21, %v668_v45  ;;  %v683_v52 = vadd.f32 %v680_v21, %v665_v49  ;;  %v698_v60 = vld [vmem:[%s1156_s17] sm:$0xf] }
 0x12f   : > { %v678_v19 = vld [vmem:[#allocation2 + $0x28] sm:$0xff]  ;;  %v692_v33 = vadd.f32 %v680_v21, %v674_v29  ;;  %v703_v41 = vpack.c.bf16 %v690_v38, %v689_v37  ;;  %v702_v46 = vpack.c.bf16 %v688_v43, %v687_v42  ;;  %v684_v53 = vadd.f32 %v680_v21, %v666_v50  ;;  %v697_v61 = vld [vmem:[%s1221_s9] sm:$0xff] }
 0x130   : > { %v696_v25 = vadd.f32 %v680_v21, %v678_v19  ;;  %v701_v51 = vpack.c.bf16 %v686_v48, %v685_v47  ;;  %v681_v57 = vadd.f32 %v680_v21, %v663_v54  ;;  %v682_v58 = vadd.f32 %v680_v21, %v664_v55 }
 0x131   : > { %v704_v36 = vpack.c.bf16 %v692_v33, %v691_v32  ;;  %v700_v56 = vpack.c.bf16 %v684_v53, %v683_v52 }
 0x132   : > { %v706_v30 = vpack.c.bf16 %v696_v25, %v695_v24  ;;  %v699_v59 = vpack.c.bf16 %v682_v58, %v681_v57 }
 0x134   : > { %707 = vmatpush.bf16.msra.mxu0 %v706_v30 }
 0x138   : > { %708 = vmatpush.bf16.msra.mxu0 %v705_v31 }
 0x13c   : > { %709 = vmatpush.bf16.msra.mxu0 %v704_v36 }
 0x140   : > { %710 = vmatpush.bf16.msra.mxu0 %v703_v41 }
 0x144   : > { %711 = vmatpush.bf16.msra.mxu0 %v702_v46 }
 0x148   : > { %712 = vmatpush.bf16.msra.mxu0 %v701_v51 }
 0x14c   : > { %713 = vmatpush.bf16.msra.mxu0 %v700_v56 }
 0x150   : > { %714 = vmatpush.bf16.msra.mxu0 %v699_v59 }
 0x153   : > { %715 = vmatmul.bf16.vlgmr.msra.gmra.mxu0 %v698_v60 }
 0x1d0   : > { %v716_v62 = vpop.f32.mrf.mxu0 }
 0x1d1   : > { %v720_v63 = vadd.f32 %v716_v62, %v697_v61 }
 0x1d3   : > { %721 = vst [vmem:[%s1221_s9] sm:$0xff] %v720_v63 }
 0x1d8   : > { %v718_v0 = vpop.f32.mrf.mxu0 }
 0x1d9 PF: > { %p870_p13 = scmp.ne.s32.totalorder %s1102_s2, 4 }
 0x1db   : > { %725 = sbr.rel (%p870_p13) target bundleno = 487 (0x1e7), region = 97 }
 0x1e0   : > { %v726_v1 = vld [vmem:[%s1221_s9] sm:$0xff] }
 0x1e1   : > { %v727_v2 = vld [vmem:[%s1220_s8] sm:$0xff] }
 0x1e2   : > { %v728_v3 = vperm.slane %v727_v2, 0 }
 0x1e4   : > { %v729_v4 = vadd.f32 %v728_v3, %v726_v1 }
 0x1e6   : > { %730 = vst [vmem:[%s1221_s9] sm:$0xff] %v729_v4 }
 0x1e7 PF: > { %p39_p0 = scmp.ge.s32.totalorder %s1105_s3, 7   ;;  %s1225_s1 = smov %s1012_s24 }
 0x1e8   : > { %s1226_s24 = smov %s1116_s13  ;;  %s1227_s25 = smov %s1105_s3 }
 0x1e9   :  { %41 = sbr.rel (!%p39_p0) target bundleno = 13 (0xd), region = 134 }

</bundles_post_ra>
